<compile_context>
chip_gen: v6e
topology: v6e:2x2x1
jax: 0.10.0
libtpu: 0.0.40
codegen_flags: <defaults>
</compile_context>

<pallas_src>
import jax
import jax.numpy as jnp
import numpy as np
from jax import lax
from jax.experimental import pallas as pl
from jax.experimental.pallas import tpu as pltpu


# ----------------------------------------------------------------------------
# Shared LSTM cell (gate pre-activations -> new h, c).  PyTorch gate order.
# ----------------------------------------------------------------------------
def _lstm_cell(gates, c, H):
    i = jax.nn.sigmoid(gates[:, 0:H])
    f = jax.nn.sigmoid(gates[:, H:2 * H])
    g = jnp.tanh(gates[:, 2 * H:3 * H])
    o = jax.nn.sigmoid(gates[:, 3 * H:4 * H])
    c_new = f * c + i * g
    h_new = o * jnp.tanh(c_new)
    return h_new, c_new


# ----------------------------------------------------------------------------
# Pallas kernels
# ----------------------------------------------------------------------------
def _bilstm_layer_kernel(gxf_ref, gxr_ref, whhf_ref, whhr_ref,
                         outf_ref, outr_ref, state_ref):
    """One time tile of the fused, INTERLEAVED fwd+rev recurrence.

    gxf_ref : (Tt, B, 4H) bf16 pre-activations, forward time block t.
    gxr_ref : (Tt, B, 4H) bf16 pre-activations, reverse time block nt-1-t.
    whhf/whhr : (H, 4H) bf16 recurrent weights (transposed).
    outf/outr : (Tt, B, H) bf16 per-direction hidden states.
    state_ref : (4, B, H) f32 scratch = (h_f, c_f, h_r, c_r), carried across
                the grid.
    """
    Tt, B, _ = gxf_ref.shape
    H = whhf_ref.shape[0]

    @pl.when(pl.program_id(0) == 0)
    def _():
        state_ref[...] = jnp.zeros_like(state_ref)

    whh_f = whhf_ref[...]
    whh_r = whhr_ref[...]

    def body(s, carry):
        h_f, c_f, h_r, c_r = carry
        t_r = Tt - 1 - s
        # Two independent chains per iteration -> MXU/EUP/VPU overlap.
        gf = gxf_ref[s].astype(jnp.float32) + jnp.dot(
            h_f.astype(jnp.bfloat16), whh_f, preferred_element_type=jnp.float32)
        gr = gxr_ref[t_r].astype(jnp.float32) + jnp.dot(
            h_r.astype(jnp.bfloat16), whh_r, preferred_element_type=jnp.float32)
        h_f, c_f = _lstm_cell(gf, c_f, H)
        h_r, c_r = _lstm_cell(gr, c_r, H)
        outf_ref[s] = h_f.astype(outf_ref.dtype)
        outr_ref[t_r] = h_r.astype(outr_ref.dtype)
        return h_f, c_f, h_r, c_r

    carry0 = (state_ref[0], state_ref[1], state_ref[2], state_ref[3])
    h_f, c_f, h_r, c_r = lax.fori_loop(0, Tt, body, carry0,
                                       unroll=min(Tt, 8))
    state_ref[0] = h_f
    state_ref[1] = c_f
    state_ref[2] = h_r
    state_ref[3] = c_r


def _top_layer_fc_kernel(gxf_ref, gxr_last_ref, whhf_ref, fcw_ref, fcb_ref,
                         out_ref, state_ref):
    """Top LSTM layer (time-tiled forward recurrence) + fused Linear head.

    Only lstm_out[:, -1, :] is consumed downstream:
      * forward: full recurrence, keep only final h (state in scratch);
      * reverse: one step from zero state at t=T-1 (h@W_hh and f*c vanish);
      * FC: split-K over [h_fwd, h_rev] -> no concat.
    """
    Tt, B, _ = gxf_ref.shape
    H = whhf_ref.shape[0]

    @pl.when(pl.program_id(0) == 0)
    def _():
        state_ref[...] = jnp.zeros_like(state_ref)

    whh_f = whhf_ref[...]

    def body(s, carry):
        h, c = carry
        g = gxf_ref[s].astype(jnp.float32) + jnp.dot(
            h.astype(jnp.bfloat16), whh_f, preferred_element_type=jnp.float32)
        return _lstm_cell(g, c, H)

    h_f, c_f = lax.fori_loop(0, Tt, body, (state_ref[0], state_ref[1]),
                             unroll=min(Tt, 8))
    state_ref[0] = h_f
    state_ref[1] = c_f

    @pl.when(pl.program_id(0) == pl.num_programs(0) - 1)
    def _():
        # Reverse direction, single step from zero initial state.
        gr = gxr_last_ref[...].astype(jnp.float32)       # (B, 4H)
        i = jax.nn.sigmoid(gr[:, 0:H])
        g = jnp.tanh(gr[:, 2 * H:3 * H])
        o = jax.nn.sigmoid(gr[:, 3 * H:4 * H])
        h_r = o * jnp.tanh(i * g)

        fcw = fcw_ref[...]                               # (2H, O) bf16
        out = (jnp.dot(h_f.astype(jnp.bfloat16), fcw[:H],
                       preferred_element_type=jnp.float32)
               + jnp.dot(h_r.astype(jnp.bfloat16), fcw[H:],
                         preferred_element_type=jnp.float32)
               + fcb_ref[...].astype(jnp.float32))
        out_ref[...] = out.astype(out_ref.dtype)


# ----------------------------------------------------------------------------
# pallas_call wrappers
# ----------------------------------------------------------------------------
def lstm_bidir_layer(gx_f, gx_r, whh_f_t, whh_r_t, *, time_tile):
    """gx_f/gx_r: (T, B, 4H) bf16 pre-activations.  Returns fwd/rev (T, B, H)."""
    T, B, G = gx_f.shape
    H = whh_f_t.shape[0]
    Tt = time_tile
    nt = T // Tt

    cost = pl.CostEstimate(
        flops=2 * T * (2 * B * H * G) + 2 * T * B * 12 * H,
        transcendentals=2 * T * B * 5 * H,
        bytes_accessed=(2 * T * B * G + 2 * T * B * H + 2 * H * G) * 2,
    )

    return pl.pallas_call(
        _bilstm_layer_kernel,
        out_shape=(jax.ShapeDtypeStruct((T, B, H), jnp.bfloat16),
                   jax.ShapeDtypeStruct((T, B, H), jnp.bfloat16)),
        grid=(nt,),
        in_specs=[
            pl.BlockSpec((Tt, B, G), lambda t: (t, 0, 0)),           # gx fwd
            pl.BlockSpec((Tt, B, G), lambda t: (nt - 1 - t, 0, 0)),  # gx rev
            pl.BlockSpec((H, G), lambda t: (0, 0)),                  # W_hh^T fwd
            pl.BlockSpec((H, G), lambda t: (0, 0)),                  # W_hh^T rev
        ],
        out_specs=(pl.BlockSpec((Tt, B, H), lambda t: (t, 0, 0)),
                   pl.BlockSpec((Tt, B, H), lambda t: (nt - 1 - t, 0, 0))),
        scratch_shapes=[pltpu.VMEM((4, B, H), jnp.float32)],
        compiler_params=pltpu.CompilerParams(
            dimension_semantics=("arbitrary",)),
        cost_estimate=cost,
    )(gx_f, gx_r, whh_f_t, whh_r_t)


def lstm_top_and_fc(gx_f, gx_r_last, whh_f_t, fc_w_t, fc_b, *, time_tile):
    """Top layer recurrence + fused FC.  Returns (B, output_size) f32."""
    T, B, G = gx_f.shape
    H = whh_f_t.shape[0]
    O = fc_w_t.shape[1]
    Tt = time_tile
    nt = T // Tt

    cost = pl.CostEstimate(
        flops=T * 2 * B * H * G + 4 * B * H * O + T * B * 12 * H,
        transcendentals=T * B * 5 * H + B * 3 * H,
        bytes_accessed=(T * B * G + B * G + H * G + 2 * H * O) * 2 + B * O * 4,
    )

    return pl.pallas_call(
        _top_layer_fc_kernel,
        out_shape=jax.ShapeDtypeStruct((B, O), jnp.float32),
        grid=(nt,),
        in_specs=[
            pl.BlockSpec((Tt, B, G), lambda t: (t, 0, 0)),   # gx fwd tiles
            pl.BlockSpec((B, G), lambda t: (0, 0)),          # gx rev @ t=T-1
            pl.BlockSpec((H, G), lambda t: (0, 0)),          # W_hh^T fwd
            pl.BlockSpec((2 * H, O), lambda t: (0, 0)),      # fc W^T
            pl.BlockSpec((1, O), lambda t: (0, 0)),          # fc b
        ],
        out_specs=pl.BlockSpec((B, O), lambda t: (0, 0)),
        scratch_shapes=[pltpu.VMEM((2, B, H), jnp.float32)],
        compiler_params=pltpu.CompilerParams(
            dimension_semantics=("arbitrary",)),
        cost_estimate=cost,
    )(gx_f, gx_r_last, whh_f_t, fc_w_t, fc_b)


# ----------------------------------------------------------------------------
# Full forward pass (matches BiLSTMModel.forward: fc(lstm(x)[0][:, -1, :]))
# ----------------------------------------------------------------------------
def bilstm_forward(x, params, *, time_tile=4):
    """x: (B, T, input_size) f32 -> (B, output_size) f32."""
    B0, T, _ = x.shape
    layers = params["lstm"]
    H = layers[0][0][1].shape[0]

    # Pad batch to a multiple of 8 (sublane alignment inside the kernels).
    Bp = ((B0 + 7) // 8) * 8
    if Bp != B0:
        x = jnp.pad(x, ((0, Bp - B0), (0, 0), (0, 0)))

    # Largest time tile that divides T and is <= requested tile.
    Tt = max(1, min(time_tile, T))
    while T % Tt:
        Tt -= 1

    x_tm = jnp.transpose(x, (1, 0, 2)).astype(jnp.bfloat16)   # (T, Bp, F)

    def proj_first(act, w_t, bias):
        g = jnp.einsum("tbf,fg->tbg", act, w_t,
                       preferred_element_type=jnp.float32) + bias
        return g.astype(jnp.bfloat16)

    def proj_deep(f_act, r_act, w_t, bias):
        # Split W_ih along K -> no (T, B, 2H) concat ever materialized.
        g = (jnp.einsum("tbh,hg->tbg", f_act, w_t[:H],
                        preferred_element_type=jnp.float32)
             + jnp.einsum("tbh,hg->tbg", r_act, w_t[H:],
                          preferred_element_type=jnp.float32)) + bias
        return g.astype(jnp.bfloat16)

    cur_f = cur_r = None
    for layer_idx in range(len(layers) - 1):
        (wih_f_t, whh_f_t, b_f), (wih_r_t, whh_r_t, b_r) = layers[layer_idx]
        if layer_idx == 0:
            gx_f = proj_first(x_tm, wih_f_t, b_f)
            gx_r = proj_first(x_tm, wih_r_t, b_r)
        else:
            gx_f = proj_deep(cur_f, cur_r, wih_f_t, b_f)
            gx_r = proj_deep(cur_f, cur_r, wih_r_t, b_r)
        cur_f, cur_r = lstm_bidir_layer(gx_f, gx_r, whh_f_t, whh_r_t,
                                        time_tile=Tt)
        # inter-layer dropout == identity at inference

    # Top layer: fwd needs the full pre-activation sequence, rev needs only
    # timestep T-1 (single step), FC head fused into the kernel.
    (wih_f_t, whh_f_t, b_f), (wih_r_t, _, b_r) = layers[-1]
    if cur_f is None:                               # single-layer model
        gx_f = proj_first(x_tm, wih_f_t, b_f)
        gx_r_last = (jnp.dot(x_tm[T - 1], wih_r_t,
                             preferred_element_type=jnp.float32)
                     + b_r).astype(jnp.bfloat16)
    else:
        gx_f = proj_deep(cur_f, cur_r, wih_f_t, b_f)
        gx_r_last = (jnp.dot(cur_f[T - 1], wih_r_t[:H],
                             preferred_element_type=jnp.float32)
                     + jnp.dot(cur_r[T - 1], wih_r_t[H:],
                               preferred_element_type=jnp.float32)
                     + b_r).astype(jnp.bfloat16)

    out = lstm_top_and_fc(gx_f, gx_r_last, whh_f_t,
                          params["fc_w_t"], params["fc_b"], time_tile=Tt)
    return out[:B0]


# ----------------------------------------------------------------------------
# Pure-JAX f32 reference (PyTorch nn.LSTM / nn.Linear semantics)
# ----------------------------------------------------------------------------
def _lstm_dir_ref(x_btf, wih, whh, bias, reverse):
    B, T, _ = x_btf.shape
    H = whh.shape[1]
    h = jnp.zeros((B, H), jnp.float32)
    c = jnp.zeros((B, H), jnp.float32)
    outs = [None] * T
    steps = range(T - 1, -1, -1) if reverse else range(T)
    for t in steps:
        gates = x_btf[:, t] @ wih.T + h @ whh.T + bias
        i = jax.nn.sigmoid(gates[:, :H])
        f = jax.nn.sigmoid(gates[:, H:2 * H])
        g = jnp.tanh(gates[:, 2 * H:3 * H])
        o = jax.nn.sigmoid(gates[:, 3 * H:])
        c = f * c + i * g
        h = o * jnp.tanh(c)
        outs[t] = h
    return jnp.stack(outs, axis=1)  # (B, T, H)


def bilstm_ref(x, raw_params):
    layer_in = x
    for (wih_f, whh_f, b_f), (wih_b, whh_b, b_b) in raw_params["lstm"]:
        out_f = _lstm_dir_ref(layer_in, wih_f, whh_f, b_f, reverse=False)
        out_b = _lstm_dir_ref(layer_in, wih_b, whh_b, b_b, reverse=True)
        layer_in = jnp.concatenate([out_f, out_b], axis=-1)
    last = layer_in[:, -1, :]
    return last @ raw_params["fc_w"].T + raw_params["fc_b"]


# ----------------------------------------------------------------------------
# Deterministic parameter init (PyTorch-style uniform(-1/sqrt(H), 1/sqrt(H)))
# ----------------------------------------------------------------------------
def init_params(key, input_size, hidden_size, num_layers, output_size):
    H = hidden_size
    bound = 1.0 / np.sqrt(H)
    raw = {"lstm": []}
    kernel = {"lstm": []}
    for layer in range(num_layers):
        in_sz = input_size if layer == 0 else 2 * H
        layer_raw, layer_kern = [], []
        for _ in range(2):  # forward, reverse
            key, k1, k2, k3, k4 = jax.random.split(key, 5)
            wih = jax.random.uniform(k1, (4 * H, in_sz), jnp.float32, -bound, bound)
            whh = jax.random.uniform(k2, (4 * H, H), jnp.float32, -bound, bound)
            bih = jax.random.uniform(k3, (4 * H,), jnp.float32, -bound, bound)
            bhh = jax.random.uniform(k4, (4 * H,), jnp.float32, -bound, bound)
            b = bih + bhh
            layer_raw.append((wih, whh, b))
            # Kernel form: transposed for x@W, bf16 matmul operands, f32 bias.
            layer_kern.append((wih.T.astype(jnp.bfloat16),
                               whh.T.astype(jnp.bfloat16),
                               b))
        raw["lstm"].append(tuple(layer_raw))
        kernel["lstm"].append(tuple(layer_kern))
    fc_bound = 1.0 / np.sqrt(2 * H)
    key, k1, k2 = jax.random.split(key, 3)
    fc_w = jax.random.uniform(k1, (output_size, 2 * H), jnp.float32, -fc_bound, fc_bound)
    fc_b = jax.random.uniform(k2, (output_size,), jnp.float32, -fc_bound, fc_bound)
    raw["fc_w"], raw["fc_b"] = fc_w, fc_b
    kernel["fc_w_t"] = fc_w.T.astype(jnp.bfloat16)
    kernel["fc_b"] = fc_b.reshape(1, output_size)
    return kernel, raw


# ----------------------------------------------------------------------------
if __name__ == "__main__":
    B, T = 2, 8
    input_size, hidden_size, num_layers, output_size = 4, 32, 2, 3

    key = jax.random.PRNGKey(0)
    key, xkey = jax.random.split(key)
    x = jax.random.normal(xkey, (B, T, input_size), jnp.float32)

    kernel_params, raw_params = init_params(
        key, input_size, hidden_size, num_layers, output_size)

    out = jax.jit(bilstm_forward)(x, kernel_params)
    out = jax.block_until_ready(out)

    ref = jax.block_until_ready(bilstm_ref(x, raw_params))
    assert out.shape == (B, output_size), out.shape
    # bf16 matmul operands / bf16 activation storage -> loosened tolerance
    # vs. the f32 reference (per review note).
    np.testing.assert_allclose(np.asarray(out), np.asarray(ref),
                               rtol=3e-2, atol=3e-2)

    print("KERNEL_OK")
</pallas_src>

<mosaic_0001>
module attributes {stable_mosaic.version = 11 : i64} {
  func.func @_bilstm_layer_kernel(%arg0: i32, %arg1: memref<4x8x128xbf16, #tpu.memory_space<vmem>>, %arg2: memref<4x8x128xbf16, #tpu.memory_space<vmem>>, %arg3: memref<32x128xbf16, #tpu.memory_space<vmem>>, %arg4: memref<32x128xbf16, #tpu.memory_space<vmem>>, %arg5: memref<4x8x32xbf16, #tpu.memory_space<vmem>>, %arg6: memref<4x8x32xbf16, #tpu.memory_space<vmem>>, %arg7: memref<4x8x32xf32, #tpu.memory_space<vmem>>) attributes {dimension_semantics = [#tpu.dimension_semantics<arbitrary>], iteration_bounds = array<i64: 2>, scalar_prefetch = 0 : i64, scratch_operands = 1 : i64, tpu.core_type = #tpu.core_type<tc>, window_params = [{transform_indices = @transform_0, window_bounds = array<i64: 4, 8, 128>}, {transform_indices = @transform_1, window_bounds = array<i64: 4, 8, 128>}, {pipeline_mode = #tpu.pipeline_mode<synchronous>, transform_indices = @transform_2, window_bounds = array<i64: 32, 128>}, {pipeline_mode = #tpu.pipeline_mode<synchronous>, transform_indices = @transform_3, window_bounds = array<i64: 32, 128>}, {transform_indices = @transform_4, window_bounds = array<i64: 4, 8, 32>}, {transform_indices = @transform_5, window_bounds = array<i64: 4, 8, 32>}]} {
    %c0_i32 = arith.constant 0 : i32
    %0 = arith.cmpi eq, %arg0, %c0_i32 : i32
    %1 = arith.extui %0 : i1 to i32
    %c0_i32_0 = arith.constant 0 : i32
    %2 = arith.cmpi ne, %1, %c0_i32_0 : i32
    scf.if %2 {
      %cst_93 = arith.constant 0.000000e+00 : f32
      %325 = vector.broadcast %cst_93 : f32 to vector<4x8x32xf32>
      %c0_94 = arith.constant 0 : index
      %c0_95 = arith.constant 0 : index
      %c0_96 = arith.constant 0 : index
      %326 = vector.load %arg7[%c0_94, %c0_95, %c0_96] : memref<4x8x32xf32, #tpu.memory_space<vmem>>, vector<4x8x32xf32>
      tpu.vector_store %arg7[%c0_94, %c0_95, %c0_96], %325 {strides = array<i32>} : memref<4x8x32xf32, #tpu.memory_space<vmem>>, vector<4x8x32xf32>,
    } else {
    }
    %c0 = arith.constant 0 : index
    %c0_1 = arith.constant 0 : index
    %3 = vector.load %arg3[%c0, %c0_1] : memref<32x128xbf16, #tpu.memory_space<vmem>>, vector<32x128xbf16>
    %c0_2 = arith.constant 0 : index
    %c0_3 = arith.constant 0 : index
    %4 = vector.load %arg4[%c0_2, %c0_3] : memref<32x128xbf16, #tpu.memory_space<vmem>>, vector<32x128xbf16>
    %c0_4 = arith.constant 0 : index
    %c0_5 = arith.constant 0 : index
    %c0_6 = arith.constant 0 : index
    %5 = vector.load %arg7[%c0_4, %c0_5, %c0_6] : memref<4x8x32xf32, #tpu.memory_space<vmem>>, vector<1x8x32xf32>
    %6 = vector.shape_cast %5 : vector<1x8x32xf32> to vector<8x32xf32>
    %c1 = arith.constant 1 : index
    %c0_7 = arith.constant 0 : index
    %c0_8 = arith.constant 0 : index
    %7 = vector.load %arg7[%c1, %c0_7, %c0_8] : memref<4x8x32xf32, #tpu.memory_space<vmem>>, vector<1x8x32xf32>
    %8 = vector.shape_cast %7 : vector<1x8x32xf32> to vector<8x32xf32>
    %c2 = arith.constant 2 : index
    %c0_9 = arith.constant 0 : index
    %c0_10 = arith.constant 0 : index
    %9 = vector.load %arg7[%c2, %c0_9, %c0_10] : memref<4x8x32xf32, #tpu.memory_space<vmem>>, vector<1x8x32xf32>
    %10 = vector.shape_cast %9 : vector<1x8x32xf32> to vector<8x32xf32>
    %c3 = arith.constant 3 : index
    %c0_11 = arith.constant 0 : index
    %c0_12 = arith.constant 0 : index
    %11 = vector.load %arg7[%c3, %c0_11, %c0_12] : memref<4x8x32xf32, #tpu.memory_space<vmem>>, vector<1x8x32xf32>
    %12 = vector.shape_cast %11 : vector<1x8x32xf32> to vector<8x32xf32>
    %c0_i32_13 = arith.constant 0 : i32
    %c3_i32 = arith.constant 3 : i32
    %13 = arith.subi %c3_i32, %c0_i32_13 : i32
    %14 = arith.index_cast %c0_i32_13 : i32 to index
    %c0_14 = arith.constant 0 : index
    %c0_15 = arith.constant 0 : index
    %15 = vector.load %arg1[%14, %c0_14, %c0_15] : memref<4x8x128xbf16, #tpu.memory_space<vmem>>, vector<1x8x128xbf16>
    %16 = vector.shape_cast %15 : vector<1x8x128xbf16> to vector<8x128xbf16>
    %17 = arith.extf %16 : vector<8x128xbf16> to vector<8x128xf32>
    %18 = arith.truncf %6 : vector<8x32xf32> to vector<8x32xbf16>
    %cst = arith.constant dense<0.000000e+00> : vector<8x128xf32>
    %19 = tpu.matmul %18, %3, %cst {dimension_numbers = #tpu.dot_dimension_numbers<[1], [0], [0], [1], [0, 0, 1, 1], [], []>} : vector<8x32xbf16>, vector<32x128xbf16>, vector<8x128xf32> -> vector<8x128xf32>
    %20 = arith.addf %17, %19 : vector<8x128xf32>
    %21 = arith.index_cast %13 : i32 to index
    %c0_16 = arith.constant 0 : index
    %c0_17 = arith.constant 0 : index
    %22 = vector.load %arg2[%21, %c0_16, %c0_17] : memref<4x8x128xbf16, #tpu.memory_space<vmem>>, vector<1x8x128xbf16>
    %23 = vector.shape_cast %22 : vector<1x8x128xbf16> to vector<8x128xbf16>
    %24 = arith.extf %23 : vector<8x128xbf16> to vector<8x128xf32>
    %25 = arith.truncf %10 : vector<8x32xf32> to vector<8x32xbf16>
    %cst_18 = arith.constant dense<0.000000e+00> : vector<8x128xf32>
    %26 = tpu.matmul %25, %4, %cst_18 {dimension_numbers = #tpu.dot_dimension_numbers<[1], [0], [0], [1], [0, 0, 1, 1], [], []>} : vector<8x32xbf16>, vector<32x128xbf16>, vector<8x128xf32> -> vector<8x128xf32>
    %27 = arith.addf %24, %26 : vector<8x128xf32>
    %28 = vector.extract_strided_slice %20 {offsets = [0, 0], sizes = [8, 32], strides = [1, 1]} : vector<8x128xf32> to vector<8x32xf32>
    %29 = arith.negf %28 : vector<8x32xf32>
    %30 = math.exp %29 : vector<8x32xf32>
    %cst_19 = arith.constant 1.000000e+00 : f32
    %31 = vector.broadcast %cst_19 : f32 to vector<8x32xf32>
    %32 = arith.addf %31, %30 : vector<8x32xf32>
    %33 = arith.divf %31, %32 : vector<8x32xf32>
    %34 = vector.extract_strided_slice %20 {offsets = [0, 32], sizes = [8, 32], strides = [1, 1]} : vector<8x128xf32> to vector<8x32xf32>
    %35 = arith.negf %34 : vector<8x32xf32>
    %36 = math.exp %35 : vector<8x32xf32>
    %cst_20 = arith.constant 1.000000e+00 : f32
    %37 = vector.broadcast %cst_20 : f32 to vector<8x32xf32>
    %38 = arith.addf %37, %36 : vector<8x32xf32>
    %39 = arith.divf %37, %38 : vector<8x32xf32>
    %40 = vector.extract_strided_slice %20 {offsets = [0, 64], sizes = [8, 32], strides = [1, 1]} : vector<8x128xf32> to vector<8x32xf32>
    %41 = math.tanh %40 : vector<8x32xf32>
    %42 = vector.extract_strided_slice %20 {offsets = [0, 96], sizes = [8, 32], strides = [1, 1]} : vector<8x128xf32> to vector<8x32xf32>
    %43 = arith.negf %42 : vector<8x32xf32>
    %44 = math.exp %43 : vector<8x32xf32>
    %cst_21 = arith.constant 1.000000e+00 : f32
    %45 = vector.broadcast %cst_21 : f32 to vector<8x32xf32>
    %46 = arith.addf %45, %44 : vector<8x32xf32>
    %47 = arith.divf %45, %46 : vector<8x32xf32>
    %48 = arith.mulf %39, %8 : vector<8x32xf32>
    %49 = arith.mulf %33, %41 : vector<8x32xf32>
    %50 = arith.addf %48, %49 : vector<8x32xf32>
    %51 = math.tanh %50 : vector<8x32xf32>
    %52 = arith.mulf %47, %51 : vector<8x32xf32>
    %53 = vector.extract_strided_slice %27 {offsets = [0, 0], sizes = [8, 32], strides = [1, 1]} : vector<8x128xf32> to vector<8x32xf32>
    %54 = arith.negf %53 : vector<8x32xf32>
    %55 = math.exp %54 : vector<8x32xf32>
    %cst_22 = arith.constant 1.000000e+00 : f32
    %56 = vector.broadcast %cst_22 : f32 to vector<8x32xf32>
    %57 = arith.addf %56, %55 : vector<8x32xf32>
    %58 = arith.divf %56, %57 : vector<8x32xf32>
    %59 = vector.extract_strided_slice %27 {offsets = [0, 32], sizes = [8, 32], strides = [1, 1]} : vector<8x128xf32> to vector<8x32xf32>
    %60 = arith.negf %59 : vector<8x32xf32>
    %61 = math.exp %60 : vector<8x32xf32>
    %cst_23 = arith.constant 1.000000e+00 : f32
    %62 = vector.broadcast %cst_23 : f32 to vector<8x32xf32>
    %63 = arith.addf %62, %61 : vector<8x32xf32>
    %64 = arith.divf %62, %63 : vector<8x32xf32>
    %65 = vector.extract_strided_slice %27 {offsets = [0, 64], sizes = [8, 32], strides = [1, 1]} : vector<8x128xf32> to vector<8x32xf32>
    %66 = math.tanh %65 : vector<8x32xf32>
    %67 = vector.extract_strided_slice %27 {offsets = [0, 96], sizes = [8, 32], strides = [1, 1]} : vector<8x128xf32> to vector<8x32xf32>
    %68 = arith.negf %67 : vector<8x32xf32>
    %69 = math.exp %68 : vector<8x32xf32>
    %cst_24 = arith.constant 1.000000e+00 : f32
    %70 = vector.broadcast %cst_24 : f32 to vector<8x32xf32>
    %71 = arith.addf %70, %69 : vector<8x32xf32>
    %72 = arith.divf %70, %71 : vector<8x32xf32>
    %73 = arith.mulf %64, %12 : vector<8x32xf32>
    %74 = arith.mulf %58, %66 : vector<8x32xf32>
    %75 = arith.addf %73, %74 : vector<8x32xf32>
    %76 = math.tanh %75 : vector<8x32xf32>
    %77 = arith.mulf %72, %76 : vector<8x32xf32>
    %78 = arith.truncf %52 : vector<8x32xf32> to vector<8x32xbf16>
    %79 = arith.index_cast %c0_i32_13 : i32 to index
    %c0_25 = arith.constant 0 : index
    %c0_26 = arith.constant 0 : index
    %80 = vector.load %arg5[%79, %c0_25, %c0_26] : memref<4x8x32xbf16, #tpu.memory_space<vmem>>, vector<1x8x32xbf16>
    %81 = vector.shape_cast %80 : vector<1x8x32xbf16> to vector<8x32xbf16>
    %82 = vector.shape_cast %78 : vector<8x32xbf16> to vector<1x8x32xbf16>
    tpu.vector_store %arg5[%79, %c0_25, %c0_26], %82 {strides = array<i32>} : memref<4x8x32xbf16, #tpu.memory_space<vmem>>, vector<1x8x32xbf16>,
    %83 = arith.truncf %77 : vector<8x32xf32> to vector<8x32xbf16>
    %84 = arith.index_cast %13 : i32 to index
    %c0_27 = arith.constant 0 : index
    %c0_28 = arith.constant 0 : index
    %85 = vector.load %arg6[%84, %c0_27, %c0_28] : memref<4x8x32xbf16, #tpu.memory_space<vmem>>, vector<1x8x32xbf16>
    %86 = vector.shape_cast %85 : vector<1x8x32xbf16> to vector<8x32xbf16>
    %87 = vector.shape_cast %83 : vector<8x32xbf16> to vector<1x8x32xbf16>
    tpu.vector_store %arg6[%84, %c0_27, %c0_28], %87 {strides = array<i32>} : memref<4x8x32xbf16, #tpu.memory_space<vmem>>, vector<1x8x32xbf16>,
    %c1_i32 = arith.constant 1 : i32
    %c3_i32_29 = arith.constant 3 : i32
    %88 = arith.subi %c3_i32_29, %c1_i32 : i32
    %89 = arith.index_cast %c1_i32 : i32 to index
    %c0_30 = arith.constant 0 : index
    %c0_31 = arith.constant 0 : index
    %90 = vector.load %arg1[%89, %c0_30, %c0_31] : memref<4x8x128xbf16, #tpu.memory_space<vmem>>, vector<1x8x128xbf16>
    %91 = vector.shape_cast %90 : vector<1x8x128xbf16> to vector<8x128xbf16>
    %92 = arith.extf %91 : vector<8x128xbf16> to vector<8x128xf32>
    %93 = arith.truncf %52 : vector<8x32xf32> to vector<8x32xbf16>
    %cst_32 = arith.constant dense<0.000000e+00> : vector<8x128xf32>
    %94 = tpu.matmul %93, %3, %cst_32 {dimension_numbers = #tpu.dot_dimension_numbers<[1], [0], [0], [1], [0, 0, 1, 1], [], []>} : vector<8x32xbf16>, vector<32x128xbf16>, vector<8x128xf32> -> vector<8x128xf32>
    %95 = arith.addf %92, %94 : vector<8x128xf32>
    %96 = arith.index_cast %88 : i32 to index
    %c0_33 = arith.constant 0 : index
    %c0_34 = arith.constant 0 : index
    %97 = vector.load %arg2[%96, %c0_33, %c0_34] : memref<4x8x128xbf16, #tpu.memory_space<vmem>>, vector<1x8x128xbf16>
    %98 = vector.shape_cast %97 : vector<1x8x128xbf16> to vector<8x128xbf16>
    %99 = arith.extf %98 : vector<8x128xbf16> to vector<8x128xf32>
    %100 = arith.truncf %77 : vector<8x32xf32> to vector<8x32xbf16>
    %cst_35 = arith.constant dense<0.000000e+00> : vector<8x128xf32>
    %101 = tpu.matmul %100, %4, %cst_35 {dimension_numbers = #tpu.dot_dimension_numbers<[1], [0], [0], [1], [0, 0, 1, 1], [], []>} : vector<8x32xbf16>, vector<32x128xbf16>, vector<8x128xf32> -> vector<8x128xf32>
    %102 = arith.addf %99, %101 : vector<8x128xf32>
    %103 = vector.extract_strided_slice %95 {offsets = [0, 0], sizes = [8, 32], strides = [1, 1]} : vector<8x128xf32> to vector<8x32xf32>
    %104 = arith.negf %103 : vector<8x32xf32>
    %105 = math.exp %104 : vector<8x32xf32>
    %cst_36 = arith.constant 1.000000e+00 : f32
    %106 = vector.broadcast %cst_36 : f32 to vector<8x32xf32>
    %107 = arith.addf %106, %105 : vector<8x32xf32>
    %108 = arith.divf %106, %107 : vector<8x32xf32>
    %109 = vector.extract_strided_slice %95 {offsets = [0, 32], sizes = [8, 32], strides = [1, 1]} : vector<8x128xf32> to vector<8x32xf32>
    %110 = arith.negf %109 : vector<8x32xf32>
    %111 = math.exp %110 : vector<8x32xf32>
    %cst_37 = arith.constant 1.000000e+00 : f32
    %112 = vector.broadcast %cst_37 : f32 to vector<8x32xf32>
    %113 = arith.addf %112, %111 : vector<8x32xf32>
    %114 = arith.divf %112, %113 : vector<8x32xf32>
    %115 = vector.extract_strided_slice %95 {offsets = [0, 64], sizes = [8, 32], strides = [1, 1]} : vector<8x128xf32> to vector<8x32xf32>
    %116 = math.tanh %115 : vector<8x32xf32>
    %117 = vector.extract_strided_slice %95 {offsets = [0, 96], sizes = [8, 32], strides = [1, 1]} : vector<8x128xf32> to vector<8x32xf32>
    %118 = arith.negf %117 : vector<8x32xf32>
    %119 = math.exp %118 : vector<8x32xf32>
    %cst_38 = arith.constant 1.000000e+00 : f32
    %120 = vector.broadcast %cst_38 : f32 to vector<8x32xf32>
    %121 = arith.addf %120, %119 : vector<8x32xf32>
    %122 = arith.divf %120, %121 : vector<8x32xf32>
    %123 = arith.mulf %114, %50 : vector<8x32xf32>
    %124 = arith.mulf %108, %116 : vector<8x32xf32>
    %125 = arith.addf %123, %124 : vector<8x32xf32>
    %126 = math.tanh %125 : vector<8x32xf32>
    %127 = arith.mulf %122, %126 : vector<8x32xf32>
    %128 = vector.extract_strided_slice %102 {offsets = [0, 0], sizes = [8, 32], strides = [1, 1]} : vector<8x128xf32> to vector<8x32xf32>
    %129 = arith.negf %128 : vector<8x32xf32>
    %130 = math.exp %129 : vector<8x32xf32>
    %cst_39 = arith.constant 1.000000e+00 : f32
    %131 = vector.broadcast %cst_39 : f32 to vector<8x32xf32>
    %132 = arith.addf %131, %130 : vector<8x32xf32>
    %133 = arith.divf %131, %132 : vector<8x32xf32>
    %134 = vector.extract_strided_slice %102 {offsets = [0, 32], sizes = [8, 32], strides = [1, 1]} : vector<8x128xf32> to vector<8x32xf32>
    %135 = arith.negf %134 : vector<8x32xf32>
    %136 = math.exp %135 : vector<8x32xf32>
    %cst_40 = arith.constant 1.000000e+00 : f32
    %137 = vector.broadcast %cst_40 : f32 to vector<8x32xf32>
    %138 = arith.addf %137, %136 : vector<8x32xf32>
    %139 = arith.divf %137, %138 : vector<8x32xf32>
    %140 = vector.extract_strided_slice %102 {offsets = [0, 64], sizes = [8, 32], strides = [1, 1]} : vector<8x128xf32> to vector<8x32xf32>
    %141 = math.tanh %140 : vector<8x32xf32>
    %142 = vector.extract_strided_slice %102 {offsets = [0, 96], sizes = [8, 32], strides = [1, 1]} : vector<8x128xf32> to vector<8x32xf32>
    %143 = arith.negf %142 : vector<8x32xf32>
    %144 = math.exp %143 : vector<8x32xf32>
    %cst_41 = arith.constant 1.000000e+00 : f32
    %145 = vector.broadcast %cst_41 : f32 to vector<8x32xf32>
    %146 = arith.addf %145, %144 : vector<8x32xf32>
    %147 = arith.divf %145, %146 : vector<8x32xf32>
    %148 = arith.mulf %139, %75 : vector<8x32xf32>
    %149 = arith.mulf %133, %141 : vector<8x32xf32>
    %150 = arith.addf %148, %149 : vector<8x32xf32>
    %151 = math.tanh %150 : vector<8x32xf32>
    %152 = arith.mulf %147, %151 : vector<8x32xf32>
    %153 = arith.truncf %127 : vector<8x32xf32> to vector<8x32xbf16>
    %154 = arith.index_cast %c1_i32 : i32 to index
    %c0_42 = arith.constant 0 : index
    %c0_43 = arith.constant 0 : index
    %155 = vector.load %arg5[%154, %c0_42, %c0_43] : memref<4x8x32xbf16, #tpu.memory_space<vmem>>, vector<1x8x32xbf16>
    %156 = vector.shape_cast %155 : vector<1x8x32xbf16> to vector<8x32xbf16>
    %157 = vector.shape_cast %153 : vector<8x32xbf16> to vector<1x8x32xbf16>
    tpu.vector_store %arg5[%154, %c0_42, %c0_43], %157 {strides = array<i32>} : memref<4x8x32xbf16, #tpu.memory_space<vmem>>, vector<1x8x32xbf16>,
    %158 = arith.truncf %152 : vector<8x32xf32> to vector<8x32xbf16>
    %159 = arith.index_cast %88 : i32 to index
    %c0_44 = arith.constant 0 : index
    %c0_45 = arith.constant 0 : index
    %160 = vector.load %arg6[%159, %c0_44, %c0_45] : memref<4x8x32xbf16, #tpu.memory_space<vmem>>, vector<1x8x32xbf16>
    %161 = vector.shape_cast %160 : vector<1x8x32xbf16> to vector<8x32xbf16>
    %162 = vector.shape_cast %158 : vector<8x32xbf16> to vector<1x8x32xbf16>
    tpu.vector_store %arg6[%159, %c0_44, %c0_45], %162 {strides = array<i32>} : memref<4x8x32xbf16, #tpu.memory_space<vmem>>, vector<1x8x32xbf16>,
    %c2_i32 = arith.constant 2 : i32
    %c3_i32_46 = arith.constant 3 : i32
    %163 = arith.subi %c3_i32_46, %c2_i32 : i32
    %164 = arith.index_cast %c2_i32 : i32 to index
    %c0_47 = arith.constant 0 : index
    %c0_48 = arith.constant 0 : index
    %165 = vector.load %arg1[%164, %c0_47, %c0_48] : memref<4x8x128xbf16, #tpu.memory_space<vmem>>, vector<1x8x128xbf16>
    %166 = vector.shape_cast %165 : vector<1x8x128xbf16> to vector<8x128xbf16>
    %167 = arith.extf %166 : vector<8x128xbf16> to vector<8x128xf32>
    %168 = arith.truncf %127 : vector<8x32xf32> to vector<8x32xbf16>
    %cst_49 = arith.constant dense<0.000000e+00> : vector<8x128xf32>
    %169 = tpu.matmul %168, %3, %cst_49 {dimension_numbers = #tpu.dot_dimension_numbers<[1], [0], [0], [1], [0, 0, 1, 1], [], []>} : vector<8x32xbf16>, vector<32x128xbf16>, vector<8x128xf32> -> vector<8x128xf32>
    %170 = arith.addf %167, %169 : vector<8x128xf32>
    %171 = arith.index_cast %163 : i32 to index
    %c0_50 = arith.constant 0 : index
    %c0_51 = arith.constant 0 : index
    %172 = vector.load %arg2[%171, %c0_50, %c0_51] : memref<4x8x128xbf16, #tpu.memory_space<vmem>>, vector<1x8x128xbf16>
    %173 = vector.shape_cast %172 : vector<1x8x128xbf16> to vector<8x128xbf16>
    %174 = arith.extf %173 : vector<8x128xbf16> to vector<8x128xf32>
    %175 = arith.truncf %152 : vector<8x32xf32> to vector<8x32xbf16>
    %cst_52 = arith.constant dense<0.000000e+00> : vector<8x128xf32>
    %176 = tpu.matmul %175, %4, %cst_52 {dimension_numbers = #tpu.dot_dimension_numbers<[1], [0], [0], [1], [0, 0, 1, 1], [], []>} : vector<8x32xbf16>, vector<32x128xbf16>, vector<8x128xf32> -> vector<8x128xf32>
    %177 = arith.addf %174, %176 : vector<8x128xf32>
    %178 = vector.extract_strided_slice %170 {offsets = [0, 0], sizes = [8, 32], strides = [1, 1]} : vector<8x128xf32> to vector<8x32xf32>
    %179 = arith.negf %178 : vector<8x32xf32>
    %180 = math.exp %179 : vector<8x32xf32>
    %cst_53 = arith.constant 1.000000e+00 : f32
    %181 = vector.broadcast %cst_53 : f32 to vector<8x32xf32>
    %182 = arith.addf %181, %180 : vector<8x32xf32>
    %183 = arith.divf %181, %182 : vector<8x32xf32>
    %184 = vector.extract_strided_slice %170 {offsets = [0, 32], sizes = [8, 32], strides = [1, 1]} : vector<8x128xf32> to vector<8x32xf32>
    %185 = arith.negf %184 : vector<8x32xf32>
    %186 = math.exp %185 : vector<8x32xf32>
    %cst_54 = arith.constant 1.000000e+00 : f32
    %187 = vector.broadcast %cst_54 : f32 to vector<8x32xf32>
    %188 = arith.addf %187, %186 : vector<8x32xf32>
    %189 = arith.divf %187, %188 : vector<8x32xf32>
    %190 = vector.extract_strided_slice %170 {offsets = [0, 64], sizes = [8, 32], strides = [1, 1]} : vector<8x128xf32> to vector<8x32xf32>
    %191 = math.tanh %190 : vector<8x32xf32>
    %192 = vector.extract_strided_slice %170 {offsets = [0, 96], sizes = [8, 32], strides = [1, 1]} : vector<8x128xf32> to vector<8x32xf32>
    %193 = arith.negf %192 : vector<8x32xf32>
    %194 = math.exp %193 : vector<8x32xf32>
    %cst_55 = arith.constant 1.000000e+00 : f32
    %195 = vector.broadcast %cst_55 : f32 to vector<8x32xf32>
    %196 = arith.addf %195, %194 : vector<8x32xf32>
    %197 = arith.divf %195, %196 : vector<8x32xf32>
    %198 = arith.mulf %189, %125 : vector<8x32xf32>
    %199 = arith.mulf %183, %191 : vector<8x32xf32>
    %200 = arith.addf %198, %199 : vector<8x32xf32>
    %201 = math.tanh %200 : vector<8x32xf32>
    %202 = arith.mulf %197, %201 : vector<8x32xf32>
    %203 = vector.extract_strided_slice %177 {offsets = [0, 0], sizes = [8, 32], strides = [1, 1]} : vector<8x128xf32> to vector<8x32xf32>
    %204 = arith.negf %203 : vector<8x32xf32>
    %205 = math.exp %204 : vector<8x32xf32>
    %cst_56 = arith.constant 1.000000e+00 : f32
    %206 = vector.broadcast %cst_56 : f32 to vector<8x32xf32>
    %207 = arith.addf %206, %205 : vector<8x32xf32>
    %208 = arith.divf %206, %207 : vector<8x32xf32>
    %209 = vector.extract_strided_slice %177 {offsets = [0, 32], sizes = [8, 32], strides = [1, 1]} : vector<8x128xf32> to vector<8x32xf32>
    %210 = arith.negf %209 : vector<8x32xf32>
    %211 = math.exp %210 : vector<8x32xf32>
    %cst_57 = arith.constant 1.000000e+00 : f32
    %212 = vector.broadcast %cst_57 : f32 to vector<8x32xf32>
    %213 = arith.addf %212, %211 : vector<8x32xf32>
    %214 = arith.divf %212, %213 : vector<8x32xf32>
    %215 = vector.extract_strided_slice %177 {offsets = [0, 64], sizes = [8, 32], strides = [1, 1]} : vector<8x128xf32> to vector<8x32xf32>
    %216 = math.tanh %215 : vector<8x32xf32>
    %217 = vector.extract_strided_slice %177 {offsets = [0, 96], sizes = [8, 32], strides = [1, 1]} : vector<8x128xf32> to vector<8x32xf32>
    %218 = arith.negf %217 : vector<8x32xf32>
    %219 = math.exp %218 : vector<8x32xf32>
    %cst_58 = arith.constant 1.000000e+00 : f32
    %220 = vector.broadcast %cst_58 : f32 to vector<8x32xf32>
    %221 = arith.addf %220, %219 : vector<8x32xf32>
    %222 = arith.divf %220, %221 : vector<8x32xf32>
    %223 = arith.mulf %214, %150 : vector<8x32xf32>
    %224 = arith.mulf %208, %216 : vector<8x32xf32>
    %225 = arith.addf %223, %224 : vector<8x32xf32>
    %226 = math.tanh %225 : vector<8x32xf32>
    %227 = arith.mulf %222, %226 : vector<8x32xf32>
    %228 = arith.truncf %202 : vector<8x32xf32> to vector<8x32xbf16>
    %229 = arith.index_cast %c2_i32 : i32 to index
    %c0_59 = arith.constant 0 : index
    %c0_60 = arith.constant 0 : index
    %230 = vector.load %arg5[%229, %c0_59, %c0_60] : memref<4x8x32xbf16, #tpu.memory_space<vmem>>, vector<1x8x32xbf16>
    %231 = vector.shape_cast %230 : vector<1x8x32xbf16> to vector<8x32xbf16>
    %232 = vector.shape_cast %228 : vector<8x32xbf16> to vector<1x8x32xbf16>
    tpu.vector_store %arg5[%229, %c0_59, %c0_60], %232 {strides = array<i32>} : memref<4x8x32xbf16, #tpu.memory_space<vmem>>, vector<1x8x32xbf16>,
    %233 = arith.truncf %227 : vector<8x32xf32> to vector<8x32xbf16>
    %234 = arith.index_cast %163 : i32 to index
    %c0_61 = arith.constant 0 : index
    %c0_62 = arith.constant 0 : index
    %235 = vector.load %arg6[%234, %c0_61, %c0_62] : memref<4x8x32xbf16, #tpu.memory_space<vmem>>, vector<1x8x32xbf16>
    %236 = vector.shape_cast %235 : vector<1x8x32xbf16> to vector<8x32xbf16>
    %237 = vector.shape_cast %233 : vector<8x32xbf16> to vector<1x8x32xbf16>
    tpu.vector_store %arg6[%234, %c0_61, %c0_62], %237 {strides = array<i32>} : memref<4x8x32xbf16, #tpu.memory_space<vmem>>, vector<1x8x32xbf16>,
    %c3_i32_63 = arith.constant 3 : i32
    %c3_i32_64 = arith.constant 3 : i32
    %238 = arith.subi %c3_i32_64, %c3_i32_63 : i32
    %239 = arith.index_cast %c3_i32_63 : i32 to index
    %c0_65 = arith.constant 0 : index
    %c0_66 = arith.constant 0 : index
    %240 = vector.load %arg1[%239, %c0_65, %c0_66] : memref<4x8x128xbf16, #tpu.memory_space<vmem>>, vector<1x8x128xbf16>
    %241 = vector.shape_cast %240 : vector<1x8x128xbf16> to vector<8x128xbf16>
    %242 = arith.extf %241 : vector<8x128xbf16> to vector<8x128xf32>
    %243 = arith.truncf %202 : vector<8x32xf32> to vector<8x32xbf16>
    %cst_67 = arith.constant dense<0.000000e+00> : vector<8x128xf32>
    %244 = tpu.matmul %243, %3, %cst_67 {dimension_numbers = #tpu.dot_dimension_numbers<[1], [0], [0], [1], [0, 0, 1, 1], [], []>} : vector<8x32xbf16>, vector<32x128xbf16>, vector<8x128xf32> -> vector<8x128xf32>
    %245 = arith.addf %242, %244 : vector<8x128xf32>
    %246 = arith.index_cast %238 : i32 to index
    %c0_68 = arith.constant 0 : index
    %c0_69 = arith.constant 0 : index
    %247 = vector.load %arg2[%246, %c0_68, %c0_69] : memref<4x8x128xbf16, #tpu.memory_space<vmem>>, vector<1x8x128xbf16>
    %248 = vector.shape_cast %247 : vector<1x8x128xbf16> to vector<8x128xbf16>
    %249 = arith.extf %248 : vector<8x128xbf16> to vector<8x128xf32>
    %250 = arith.truncf %227 : vector<8x32xf32> to vector<8x32xbf16>
    %cst_70 = arith.constant dense<0.000000e+00> : vector<8x128xf32>
    %251 = tpu.matmul %250, %4, %cst_70 {dimension_numbers = #tpu.dot_dimension_numbers<[1], [0], [0], [1], [0, 0, 1, 1], [], []>} : vector<8x32xbf16>, vector<32x128xbf16>, vector<8x128xf32> -> vector<8x128xf32>
    %252 = arith.addf %249, %251 : vector<8x128xf32>
    %253 = vector.extract_strided_slice %245 {offsets = [0, 0], sizes = [8, 32], strides = [1, 1]} : vector<8x128xf32> to vector<8x32xf32>
    %254 = arith.negf %253 : vector<8x32xf32>
    %255 = math.exp %254 : vector<8x32xf32>
    %cst_71 = arith.constant 1.000000e+00 : f32
    %256 = vector.broadcast %cst_71 : f32 to vector<8x32xf32>
    %257 = arith.addf %256, %255 : vector<8x32xf32>
    %258 = arith.divf %256, %257 : vector<8x32xf32>
    %259 = vector.extract_strided_slice %245 {offsets = [0, 32], sizes = [8, 32], strides = [1, 1]} : vector<8x128xf32> to vector<8x32xf32>
    %260 = arith.negf %259 : vector<8x32xf32>
    %261 = math.exp %260 : vector<8x32xf32>
    %cst_72 = arith.constant 1.000000e+00 : f32
    %262 = vector.broadcast %cst_72 : f32 to vector<8x32xf32>
    %263 = arith.addf %262, %261 : vector<8x32xf32>
    %264 = arith.divf %262, %263 : vector<8x32xf32>
    %265 = vector.extract_strided_slice %245 {offsets = [0, 64], sizes = [8, 32], strides = [1, 1]} : vector<8x128xf32> to vector<8x32xf32>
    %266 = math.tanh %265 : vector<8x32xf32>
    %267 = vector.extract_strided_slice %245 {offsets = [0, 96], sizes = [8, 32], strides = [1, 1]} : vector<8x128xf32> to vector<8x32xf32>
    %268 = arith.negf %267 : vector<8x32xf32>
    %269 = math.exp %268 : vector<8x32xf32>
    %cst_73 = arith.constant 1.000000e+00 : f32
    %270 = vector.broadcast %cst_73 : f32 to vector<8x32xf32>
    %271 = arith.addf %270, %269 : vector<8x32xf32>
    %272 = arith.divf %270, %271 : vector<8x32xf32>
    %273 = arith.mulf %264, %200 : vector<8x32xf32>
    %274 = arith.mulf %258, %266 : vector<8x32xf32>
    %275 = arith.addf %273, %274 : vector<8x32xf32>
    %276 = math.tanh %275 : vector<8x32xf32>
    %277 = arith.mulf %272, %276 : vector<8x32xf32>
    %278 = vector.extract_strided_slice %252 {offsets = [0, 0], sizes = [8, 32], strides = [1, 1]} : vector<8x128xf32> to vector<8x32xf32>
    %279 = arith.negf %278 : vector<8x32xf32>
    %280 = math.exp %279 : vector<8x32xf32>
    %cst_74 = arith.constant 1.000000e+00 : f32
    %281 = vector.broadcast %cst_74 : f32 to vector<8x32xf32>
    %282 = arith.addf %281, %280 : vector<8x32xf32>
    %283 = arith.divf %281, %282 : vector<8x32xf32>
    %284 = vector.extract_strided_slice %252 {offsets = [0, 32], sizes = [8, 32], strides = [1, 1]} : vector<8x128xf32> to vector<8x32xf32>
    %285 = arith.negf %284 : vector<8x32xf32>
    %286 = math.exp %285 : vector<8x32xf32>
    %cst_75 = arith.constant 1.000000e+00 : f32
    %287 = vector.broadcast %cst_75 : f32 to vector<8x32xf32>
    %288 = arith.addf %287, %286 : vector<8x32xf32>
    %289 = arith.divf %287, %288 : vector<8x32xf32>
    %290 = vector.extract_strided_slice %252 {offsets = [0, 64], sizes = [8, 32], strides = [1, 1]} : vector<8x128xf32> to vector<8x32xf32>
    %291 = math.tanh %290 : vector<8x32xf32>
    %292 = vector.extract_strided_slice %252 {offsets = [0, 96], sizes = [8, 32], strides = [1, 1]} : vector<8x128xf32> to vector<8x32xf32>
    %293 = arith.negf %292 : vector<8x32xf32>
    %294 = math.exp %293 : vector<8x32xf32>
    %cst_76 = arith.constant 1.000000e+00 : f32
    %295 = vector.broadcast %cst_76 : f32 to vector<8x32xf32>
    %296 = arith.addf %295, %294 : vector<8x32xf32>
    %297 = arith.divf %295, %296 : vector<8x32xf32>
    %298 = arith.mulf %289, %225 : vector<8x32xf32>
    %299 = arith.mulf %283, %291 : vector<8x32xf32>
    %300 = arith.addf %298, %299 : vector<8x32xf32>
    %301 = math.tanh %300 : vector<8x32xf32>
    %302 = arith.mulf %297, %301 : vector<8x32xf32>
    %303 = arith.truncf %277 : vector<8x32xf32> to vector<8x32xbf16>
    %304 = arith.index_cast %c3_i32_63 : i32 to index
    %c0_77 = arith.constant 0 : index
    %c0_78 = arith.constant 0 : index
    %305 = vector.load %arg5[%304, %c0_77, %c0_78] : memref<4x8x32xbf16, #tpu.memory_space<vmem>>, vector<1x8x32xbf16>
    %306 = vector.shape_cast %305 : vector<1x8x32xbf16> to vector<8x32xbf16>
    %307 = vector.shape_cast %303 : vector<8x32xbf16> to vector<1x8x32xbf16>
    tpu.vector_store %arg5[%304, %c0_77, %c0_78], %307 {strides = array<i32>} : memref<4x8x32xbf16, #tpu.memory_space<vmem>>, vector<1x8x32xbf16>,
    %308 = arith.truncf %302 : vector<8x32xf32> to vector<8x32xbf16>
    %309 = arith.index_cast %238 : i32 to index
    %c0_79 = arith.constant 0 : index
    %c0_80 = arith.constant 0 : index
    %310 = vector.load %arg6[%309, %c0_79, %c0_80] : memref<4x8x32xbf16, #tpu.memory_space<vmem>>, vector<1x8x32xbf16>
    %311 = vector.shape_cast %310 : vector<1x8x32xbf16> to vector<8x32xbf16>
    %312 = vector.shape_cast %308 : vector<8x32xbf16> to vector<1x8x32xbf16>
    tpu.vector_store %arg6[%309, %c0_79, %c0_80], %312 {strides = array<i32>} : memref<4x8x32xbf16, #tpu.memory_space<vmem>>, vector<1x8x32xbf16>,
    %c4_i32 = arith.constant 4 : i32
    %c0_81 = arith.constant 0 : index
    %c0_82 = arith.constant 0 : index
    %c0_83 = arith.constant 0 : index
    %313 = vector.load %arg7[%c0_81, %c0_82, %c0_83] : memref<4x8x32xf32, #tpu.memory_space<vmem>>, vector<1x8x32xf32>
    %314 = vector.shape_cast %313 : vector<1x8x32xf32> to vector<8x32xf32>
    %315 = vector.shape_cast %277 : vector<8x32xf32> to vector<1x8x32xf32>
    tpu.vector_store %arg7[%c0_81, %c0_82, %c0_83], %315 {strides = array<i32>} : memref<4x8x32xf32, #tpu.memory_space<vmem>>, vector<1x8x32xf32>,
    %c1_84 = arith.constant 1 : index
    %c0_85 = arith.constant 0 : index
    %c0_86 = arith.constant 0 : index
    %316 = vector.load %arg7[%c1_84, %c0_85, %c0_86] : memref<4x8x32xf32, #tpu.memory_space<vmem>>, vector<1x8x32xf32>
    %317 = vector.shape_cast %316 : vector<1x8x32xf32> to vector<8x32xf32>
    %318 = vector.shape_cast %275 : vector<8x32xf32> to vector<1x8x32xf32>
    tpu.vector_store %arg7[%c1_84, %c0_85, %c0_86], %318 {strides = array<i32>} : memref<4x8x32xf32, #tpu.memory_space<vmem>>, vector<1x8x32xf32>,
    %c2_87 = arith.constant 2 : index
    %c0_88 = arith.constant 0 : index
    %c0_89 = arith.constant 0 : index
    %319 = vector.load %arg7[%c2_87, %c0_88, %c0_89] : memref<4x8x32xf32, #tpu.memory_space<vmem>>, vector<1x8x32xf32>
    %320 = vector.shape_cast %319 : vector<1x8x32xf32> to vector<8x32xf32>
    %321 = vector.shape_cast %302 : vector<8x32xf32> to vector<1x8x32xf32>
    tpu.vector_store %arg7[%c2_87, %c0_88, %c0_89], %321 {strides = array<i32>} : memref<4x8x32xf32, #tpu.memory_space<vmem>>, vector<1x8x32xf32>,
    %c3_90 = arith.constant 3 : index
    %c0_91 = arith.constant 0 : index
    %c0_92 = arith.constant 0 : index
    %322 = vector.load %arg7[%c3_90, %c0_91, %c0_92] : memref<4x8x32xf32, #tpu.memory_space<vmem>>, vector<1x8x32xf32>
    %323 = vector.shape_cast %322 : vector<1x8x32xf32> to vector<8x32xf32>
    %324 = vector.shape_cast %300 : vector<8x32xf32> to vector<1x8x32xf32>
    tpu.vector_store %arg7[%c3_90, %c0_91, %c0_92], %324 {strides = array<i32>} : memref<4x8x32xf32, #tpu.memory_space<vmem>>, vector<1x8x32xf32>,
    return
  }
  func.func @transform_0(%arg0: i32) -> (i32, i32, i32) {
    %c0_i32 = arith.constant 0 : i32
    %c0_i32_0 = arith.constant 0 : i32
    %c0_i32_1 = arith.constant 0 : i32
    return %arg0, %c0_i32, %c0_i32_0 : i32, i32, i32
  }
  func.func @transform_1(%arg0: i32) -> (i32, i32, i32) {
    %c1_i32 = arith.constant 1 : i32
    %0 = arith.subi %c1_i32, %arg0 : i32
    %c0_i32 = arith.constant 0 : i32
    %c0_i32_0 = arith.constant 0 : i32
    %c0_i32_1 = arith.constant 0 : i32
    return %0, %c0_i32, %c0_i32_0 : i32, i32, i32
  }
  func.func @transform_2(%arg0: i32) -> (i32, i32) {
    %c0_i32 = arith.constant 0 : i32
    %c0_i32_0 = arith.constant 0 : i32
    %c0_i32_1 = arith.constant 0 : i32
    return %c0_i32, %c0_i32_0 : i32, i32
  }
  func.func @transform_3(%arg0: i32) -> (i32, i32) {
    %c0_i32 = arith.constant 0 : i32
    %c0_i32_0 = arith.constant 0 : i32
    %c0_i32_1 = arith.constant 0 : i32
    return %c0_i32, %c0_i32_0 : i32, i32
  }
  func.func @transform_4(%arg0: i32) -> (i32, i32, i32) {
    %c0_i32 = arith.constant 0 : i32
    %c0_i32_0 = arith.constant 0 : i32
    %c0_i32_1 = arith.constant 0 : i32
    return %arg0, %c0_i32, %c0_i32_0 : i32, i32, i32
  }
  func.func @transform_5(%arg0: i32) -> (i32, i32, i32) {
    %c1_i32 = arith.constant 1 : i32
    %0 = arith.subi %c1_i32, %arg0 : i32
    %c0_i32 = arith.constant 0 : i32
    %c0_i32_0 = arith.constant 0 : i32
    %c0_i32_1 = arith.constant 0 : i32
    return %0, %c0_i32, %c0_i32_0 : i32, i32, i32
  }
}

module attributes {stable_mosaic.version = 11 : i64} {
  func.func @_top_layer_fc_kernel(%arg0: i32, %arg1: memref<4x8x128xbf16, #tpu.memory_space<vmem>>, %arg2: memref<8x128xbf16, #tpu.memory_space<vmem>>, %arg3: memref<32x128xbf16, #tpu.memory_space<vmem>>, %arg4: memref<64x3xbf16, #tpu.memory_space<vmem>>, %arg5: memref<1x3xf32, #tpu.memory_space<vmem>>, %arg6: memref<8x3xf32, #tpu.memory_space<vmem>>, %arg7: memref<2x8x32xf32, #tpu.memory_space<vmem>>) attributes {dimension_semantics = [#tpu.dimension_semantics<arbitrary>], iteration_bounds = array<i64: 2>, scalar_prefetch = 0 : i64, scratch_operands = 1 : i64, tpu.core_type = #tpu.core_type<tc>, window_params = [{transform_indices = @transform_0, window_bounds = array<i64: 4, 8, 128>}, {pipeline_mode = #tpu.pipeline_mode<synchronous>, transform_indices = @transform_1, window_bounds = array<i64: 8, 128>}, {pipeline_mode = #tpu.pipeline_mode<synchronous>, transform_indices = @transform_2, window_bounds = array<i64: 32, 128>}, {pipeline_mode = #tpu.pipeline_mode<synchronous>, transform_indices = @transform_3, window_bounds = array<i64: 64, 3>}, {pipeline_mode = #tpu.pipeline_mode<synchronous>, transform_indices = @transform_4, window_bounds = array<i64: 1, 3>}, {pipeline_mode = #tpu.pipeline_mode<synchronous>, transform_indices = @transform_5, window_bounds = array<i64: 8, 3>}]} {
    %c0_i32 = arith.constant 0 : i32
    %0 = arith.cmpi eq, %arg0, %c0_i32 : i32
    %1 = arith.extui %0 : i1 to i32
    %c0_i32_0 = arith.constant 0 : i32
    %2 = arith.cmpi ne, %1, %c0_i32_0 : i32
    scf.if %2 {
      %cst_39 = arith.constant 0.000000e+00 : f32
      %145 = vector.broadcast %cst_39 : f32 to vector<2x8x32xf32>
      %c0_40 = arith.constant 0 : index
      %c0_41 = arith.constant 0 : index
      %c0_42 = arith.constant 0 : index
      %146 = vector.load %arg7[%c0_40, %c0_41, %c0_42] : memref<2x8x32xf32, #tpu.memory_space<vmem>>, vector<2x8x32xf32>
      tpu.vector_store %arg7[%c0_40, %c0_41, %c0_42], %145 {strides = array<i32>} : memref<2x8x32xf32, #tpu.memory_space<vmem>>, vector<2x8x32xf32>,
    } else {
    }
    %c0 = arith.constant 0 : index
    %c0_1 = arith.constant 0 : index
    %3 = vector.load %arg3[%c0, %c0_1] : memref<32x128xbf16, #tpu.memory_space<vmem>>, vector<32x128xbf16>
    %c0_2 = arith.constant 0 : index
    %c0_3 = arith.constant 0 : index
    %c0_4 = arith.constant 0 : index
    %4 = vector.load %arg7[%c0_2, %c0_3, %c0_4] : memref<2x8x32xf32, #tpu.memory_space<vmem>>, vector<1x8x32xf32>
    %5 = vector.shape_cast %4 : vector<1x8x32xf32> to vector<8x32xf32>
    %c1 = arith.constant 1 : index
    %c0_5 = arith.constant 0 : index
    %c0_6 = arith.constant 0 : index
    %6 = vector.load %arg7[%c1, %c0_5, %c0_6] : memref<2x8x32xf32, #tpu.memory_space<vmem>>, vector<1x8x32xf32>
    %7 = vector.shape_cast %6 : vector<1x8x32xf32> to vector<8x32xf32>
    %c0_i32_7 = arith.constant 0 : i32
    %8 = arith.index_cast %c0_i32_7 : i32 to index
    %c0_8 = arith.constant 0 : index
    %c0_9 = arith.constant 0 : index
    %9 = vector.load %arg1[%8, %c0_8, %c0_9] : memref<4x8x128xbf16, #tpu.memory_space<vmem>>, vector<1x8x128xbf16>
    %10 = vector.shape_cast %9 : vector<1x8x128xbf16> to vector<8x128xbf16>
    %11 = arith.extf %10 : vector<8x128xbf16> to vector<8x128xf32>
    %12 = arith.truncf %5 : vector<8x32xf32> to vector<8x32xbf16>
    %cst = arith.constant dense<0.000000e+00> : vector<8x128xf32>
    %13 = tpu.matmul %12, %3, %cst {dimension_numbers = #tpu.dot_dimension_numbers<[1], [0], [0], [1], [0, 0, 1, 1], [], []>} : vector<8x32xbf16>, vector<32x128xbf16>, vector<8x128xf32> -> vector<8x128xf32>
    %14 = arith.addf %11, %13 : vector<8x128xf32>
    %15 = vector.extract_strided_slice %14 {offsets = [0, 0], sizes = [8, 32], strides = [1, 1]} : vector<8x128xf32> to vector<8x32xf32>
    %16 = arith.negf %15 : vector<8x32xf32>
    %17 = math.exp %16 : vector<8x32xf32>
    %cst_10 = arith.constant 1.000000e+00 : f32
    %18 = vector.broadcast %cst_10 : f32 to vector<8x32xf32>
    %19 = arith.addf %18, %17 : vector<8x32xf32>
    %20 = arith.divf %18, %19 : vector<8x32xf32>
    %21 = vector.extract_strided_slice %14 {offsets = [0, 32], sizes = [8, 32], strides = [1, 1]} : vector<8x128xf32> to vector<8x32xf32>
    %22 = arith.negf %21 : vector<8x32xf32>
    %23 = math.exp %22 : vector<8x32xf32>
    %cst_11 = arith.constant 1.000000e+00 : f32
    %24 = vector.broadcast %cst_11 : f32 to vector<8x32xf32>
    %25 = arith.addf %24, %23 : vector<8x32xf32>
    %26 = arith.divf %24, %25 : vector<8x32xf32>
    %27 = vector.extract_strided_slice %14 {offsets = [0, 64], sizes = [8, 32], strides = [1, 1]} : vector<8x128xf32> to vector<8x32xf32>
    %28 = math.tanh %27 : vector<8x32xf32>
    %29 = vector.extract_strided_slice %14 {offsets = [0, 96], sizes = [8, 32], strides = [1, 1]} : vector<8x128xf32> to vector<8x32xf32>
    %30 = arith.negf %29 : vector<8x32xf32>
    %31 = math.exp %30 : vector<8x32xf32>
    %cst_12 = arith.constant 1.000000e+00 : f32
    %32 = vector.broadcast %cst_12 : f32 to vector<8x32xf32>
    %33 = arith.addf %32, %31 : vector<8x32xf32>
    %34 = arith.divf %32, %33 : vector<8x32xf32>
    %35 = arith.mulf %26, %7 : vector<8x32xf32>
    %36 = arith.mulf %20, %28 : vector<8x32xf32>
    %37 = arith.addf %35, %36 : vector<8x32xf32>
    %38 = math.tanh %37 : vector<8x32xf32>
    %39 = arith.mulf %34, %38 : vector<8x32xf32>
    %c1_i32 = arith.constant 1 : i32
    %40 = arith.index_cast %c1_i32 : i32 to index
    %c0_13 = arith.constant 0 : index
    %c0_14 = arith.constant 0 : index
    %41 = vector.load %arg1[%40, %c0_13, %c0_14] : memref<4x8x128xbf16, #tpu.memory_space<vmem>>, vector<1x8x128xbf16>
    %42 = vector.shape_cast %41 : vector<1x8x128xbf16> to vector<8x128xbf16>
    %43 = arith.extf %42 : vector<8x128xbf16> to vector<8x128xf32>
    %44 = arith.truncf %39 : vector<8x32xf32> to vector<8x32xbf16>
    %cst_15 = arith.constant dense<0.000000e+00> : vector<8x128xf32>
    %45 = tpu.matmul %44, %3, %cst_15 {dimension_numbers = #tpu.dot_dimension_numbers<[1], [0], [0], [1], [0, 0, 1, 1], [], []>} : vector<8x32xbf16>, vector<32x128xbf16>, vector<8x128xf32> -> vector<8x128xf32>
    %46 = arith.addf %43, %45 : vector<8x128xf32>
    %47 = vector.extract_strided_slice %46 {offsets = [0, 0], sizes = [8, 32], strides = [1, 1]} : vector<8x128xf32> to vector<8x32xf32>
    %48 = arith.negf %47 : vector<8x32xf32>
    %49 = math.exp %48 : vector<8x32xf32>
    %cst_16 = arith.constant 1.000000e+00 : f32
    %50 = vector.broadcast %cst_16 : f32 to vector<8x32xf32>
    %51 = arith.addf %50, %49 : vector<8x32xf32>
    %52 = arith.divf %50, %51 : vector<8x32xf32>
    %53 = vector.extract_strided_slice %46 {offsets = [0, 32], sizes = [8, 32], strides = [1, 1]} : vector<8x128xf32> to vector<8x32xf32>
    %54 = arith.negf %53 : vector<8x32xf32>
    %55 = math.exp %54 : vector<8x32xf32>
    %cst_17 = arith.constant 1.000000e+00 : f32
    %56 = vector.broadcast %cst_17 : f32 to vector<8x32xf32>
    %57 = arith.addf %56, %55 : vector<8x32xf32>
    %58 = arith.divf %56, %57 : vector<8x32xf32>
    %59 = vector.extract_strided_slice %46 {offsets = [0, 64], sizes = [8, 32], strides = [1, 1]} : vector<8x128xf32> to vector<8x32xf32>
    %60 = math.tanh %59 : vector<8x32xf32>
    %61 = vector.extract_strided_slice %46 {offsets = [0, 96], sizes = [8, 32], strides = [1, 1]} : vector<8x128xf32> to vector<8x32xf32>
    %62 = arith.negf %61 : vector<8x32xf32>
    %63 = math.exp %62 : vector<8x32xf32>
    %cst_18 = arith.constant 1.000000e+00 : f32
    %64 = vector.broadcast %cst_18 : f32 to vector<8x32xf32>
    %65 = arith.addf %64, %63 : vector<8x32xf32>
    %66 = arith.divf %64, %65 : vector<8x32xf32>
    %67 = arith.mulf %58, %37 : vector<8x32xf32>
    %68 = arith.mulf %52, %60 : vector<8x32xf32>
    %69 = arith.addf %67, %68 : vector<8x32xf32>
    %70 = math.tanh %69 : vector<8x32xf32>
    %71 = arith.mulf %66, %70 : vector<8x32xf32>
    %c2_i32 = arith.constant 2 : i32
    %72 = arith.index_cast %c2_i32 : i32 to index
    %c0_19 = arith.constant 0 : index
    %c0_20 = arith.constant 0 : index
    %73 = vector.load %arg1[%72, %c0_19, %c0_20] : memref<4x8x128xbf16, #tpu.memory_space<vmem>>, vector<1x8x128xbf16>
    %74 = vector.shape_cast %73 : vector<1x8x128xbf16> to vector<8x128xbf16>
    %75 = arith.extf %74 : vector<8x128xbf16> to vector<8x128xf32>
    %76 = arith.truncf %71 : vector<8x32xf32> to vector<8x32xbf16>
    %cst_21 = arith.constant dense<0.000000e+00> : vector<8x128xf32>
    %77 = tpu.matmul %76, %3, %cst_21 {dimension_numbers = #tpu.dot_dimension_numbers<[1], [0], [0], [1], [0, 0, 1, 1], [], []>} : vector<8x32xbf16>, vector<32x128xbf16>, vector<8x128xf32> -> vector<8x128xf32>
    %78 = arith.addf %75, %77 : vector<8x128xf32>
    %79 = vector.extract_strided_slice %78 {offsets = [0, 0], sizes = [8, 32], strides = [1, 1]} : vector<8x128xf32> to vector<8x32xf32>
    %80 = arith.negf %79 : vector<8x32xf32>
    %81 = math.exp %80 : vector<8x32xf32>
    %cst_22 = arith.constant 1.000000e+00 : f32
    %82 = vector.broadcast %cst_22 : f32 to vector<8x32xf32>
    %83 = arith.addf %82, %81 : vector<8x32xf32>
    %84 = arith.divf %82, %83 : vector<8x32xf32>
    %85 = vector.extract_strided_slice %78 {offsets = [0, 32], sizes = [8, 32], strides = [1, 1]} : vector<8x128xf32> to vector<8x32xf32>
    %86 = arith.negf %85 : vector<8x32xf32>
    %87 = math.exp %86 : vector<8x32xf32>
    %cst_23 = arith.constant 1.000000e+00 : f32
    %88 = vector.broadcast %cst_23 : f32 to vector<8x32xf32>
    %89 = arith.addf %88, %87 : vector<8x32xf32>
    %90 = arith.divf %88, %89 : vector<8x32xf32>
    %91 = vector.extract_strided_slice %78 {offsets = [0, 64], sizes = [8, 32], strides = [1, 1]} : vector<8x128xf32> to vector<8x32xf32>
    %92 = math.tanh %91 : vector<8x32xf32>
    %93 = vector.extract_strided_slice %78 {offsets = [0, 96], sizes = [8, 32], strides = [1, 1]} : vector<8x128xf32> to vector<8x32xf32>
    %94 = arith.negf %93 : vector<8x32xf32>
    %95 = math.exp %94 : vector<8x32xf32>
    %cst_24 = arith.constant 1.000000e+00 : f32
    %96 = vector.broadcast %cst_24 : f32 to vector<8x32xf32>
    %97 = arith.addf %96, %95 : vector<8x32xf32>
    %98 = arith.divf %96, %97 : vector<8x32xf32>
    %99 = arith.mulf %90, %69 : vector<8x32xf32>
    %100 = arith.mulf %84, %92 : vector<8x32xf32>
    %101 = arith.addf %99, %100 : vector<8x32xf32>
    %102 = math.tanh %101 : vector<8x32xf32>
    %103 = arith.mulf %98, %102 : vector<8x32xf32>
    %c3_i32 = arith.constant 3 : i32
    %104 = arith.index_cast %c3_i32 : i32 to index
    %c0_25 = arith.constant 0 : index
    %c0_26 = arith.constant 0 : index
    %105 = vector.load %arg1[%104, %c0_25, %c0_26] : memref<4x8x128xbf16, #tpu.memory_space<vmem>>, vector<1x8x128xbf16>
    %106 = vector.shape_cast %105 : vector<1x8x128xbf16> to vector<8x128xbf16>
    %107 = arith.extf %106 : vector<8x128xbf16> to vector<8x128xf32>
    %108 = arith.truncf %103 : vector<8x32xf32> to vector<8x32xbf16>
    %cst_27 = arith.constant dense<0.000000e+00> : vector<8x128xf32>
    %109 = tpu.matmul %108, %3, %cst_27 {dimension_numbers = #tpu.dot_dimension_numbers<[1], [0], [0], [1], [0, 0, 1, 1], [], []>} : vector<8x32xbf16>, vector<32x128xbf16>, vector<8x128xf32> -> vector<8x128xf32>
    %110 = arith.addf %107, %109 : vector<8x128xf32>
    %111 = vector.extract_strided_slice %110 {offsets = [0, 0], sizes = [8, 32], strides = [1, 1]} : vector<8x128xf32> to vector<8x32xf32>
    %112 = arith.negf %111 : vector<8x32xf32>
    %113 = math.exp %112 : vector<8x32xf32>
    %cst_28 = arith.constant 1.000000e+00 : f32
    %114 = vector.broadcast %cst_28 : f32 to vector<8x32xf32>
    %115 = arith.addf %114, %113 : vector<8x32xf32>
    %116 = arith.divf %114, %115 : vector<8x32xf32>
    %117 = vector.extract_strided_slice %110 {offsets = [0, 32], sizes = [8, 32], strides = [1, 1]} : vector<8x128xf32> to vector<8x32xf32>
    %118 = arith.negf %117 : vector<8x32xf32>
    %119 = math.exp %118 : vector<8x32xf32>
    %cst_29 = arith.constant 1.000000e+00 : f32
    %120 = vector.broadcast %cst_29 : f32 to vector<8x32xf32>
    %121 = arith.addf %120, %119 : vector<8x32xf32>
    %122 = arith.divf %120, %121 : vector<8x32xf32>
    %123 = vector.extract_strided_slice %110 {offsets = [0, 64], sizes = [8, 32], strides = [1, 1]} : vector<8x128xf32> to vector<8x32xf32>
    %124 = math.tanh %123 : vector<8x32xf32>
    %125 = vector.extract_strided_slice %110 {offsets = [0, 96], sizes = [8, 32], strides = [1, 1]} : vector<8x128xf32> to vector<8x32xf32>
    %126 = arith.negf %125 : vector<8x32xf32>
    %127 = math.exp %126 : vector<8x32xf32>
    %cst_30 = arith.constant 1.000000e+00 : f32
    %128 = vector.broadcast %cst_30 : f32 to vector<8x32xf32>
    %129 = arith.addf %128, %127 : vector<8x32xf32>
    %130 = arith.divf %128, %129 : vector<8x32xf32>
    %131 = arith.mulf %122, %101 : vector<8x32xf32>
    %132 = arith.mulf %116, %124 : vector<8x32xf32>
    %133 = arith.addf %131, %132 : vector<8x32xf32>
    %134 = math.tanh %133 : vector<8x32xf32>
    %135 = arith.mulf %130, %134 : vector<8x32xf32>
    %c4_i32 = arith.constant 4 : i32
    %c0_31 = arith.constant 0 : index
    %c0_32 = arith.constant 0 : index
    %c0_33 = arith.constant 0 : index
    %136 = vector.load %arg7[%c0_31, %c0_32, %c0_33] : memref<2x8x32xf32, #tpu.memory_space<vmem>>, vector<1x8x32xf32>
    %137 = vector.shape_cast %136 : vector<1x8x32xf32> to vector<8x32xf32>
    %138 = vector.shape_cast %135 : vector<8x32xf32> to vector<1x8x32xf32>
    tpu.vector_store %arg7[%c0_31, %c0_32, %c0_33], %138 {strides = array<i32>} : memref<2x8x32xf32, #tpu.memory_space<vmem>>, vector<1x8x32xf32>,
    %c1_34 = arith.constant 1 : index
    %c0_35 = arith.constant 0 : index
    %c0_36 = arith.constant 0 : index
    %139 = vector.load %arg7[%c1_34, %c0_35, %c0_36] : memref<2x8x32xf32, #tpu.memory_space<vmem>>, vector<1x8x32xf32>
    %140 = vector.shape_cast %139 : vector<1x8x32xf32> to vector<8x32xf32>
    %141 = vector.shape_cast %133 : vector<8x32xf32> to vector<1x8x32xf32>
    tpu.vector_store %arg7[%c1_34, %c0_35, %c0_36], %141 {strides = array<i32>} : memref<2x8x32xf32, #tpu.memory_space<vmem>>, vector<1x8x32xf32>,
    %c1_i32_37 = arith.constant 1 : i32
    %142 = arith.cmpi eq, %arg0, %c1_i32_37 : i32
    %143 = arith.extui %142 : i1 to i32
    %c0_i32_38 = arith.constant 0 : i32
    %144 = arith.cmpi ne, %143, %c0_i32_38 : i32
    scf.if %144 {
      %c0_39 = arith.constant 0 : index
      %c0_40 = arith.constant 0 : index
      %145 = vector.load %arg2[%c0_39, %c0_40] : memref<8x128xbf16, #tpu.memory_space<vmem>>, vector<8x128xbf16>
      %146 = arith.extf %145 : vector<8x128xbf16> to vector<8x128xf32>
      %147 = vector.extract_strided_slice %146 {offsets = [0, 0], sizes = [8, 32], strides = [1, 1]} : vector<8x128xf32> to vector<8x32xf32>
      %148 = arith.negf %147 : vector<8x32xf32>
      %149 = math.exp %148 : vector<8x32xf32>
      %cst_41 = arith.constant 1.000000e+00 : f32
      %150 = vector.broadcast %cst_41 : f32 to vector<8x32xf32>
      %151 = arith.addf %150, %149 : vector<8x32xf32>
      %152 = arith.divf %150, %151 : vector<8x32xf32>
      %153 = vector.extract_strided_slice %146 {offsets = [0, 64], sizes = [8, 32], strides = [1, 1]} : vector<8x128xf32> to vector<8x32xf32>
      %154 = math.tanh %153 : vector<8x32xf32>
      %155 = vector.extract_strided_slice %146 {offsets = [0, 96], sizes = [8, 32], strides = [1, 1]} : vector<8x128xf32> to vector<8x32xf32>
      %156 = arith.negf %155 : vector<8x32xf32>
      %157 = math.exp %156 : vector<8x32xf32>
      %cst_42 = arith.constant 1.000000e+00 : f32
      %158 = vector.broadcast %cst_42 : f32 to vector<8x32xf32>
      %159 = arith.addf %158, %157 : vector<8x32xf32>
      %160 = arith.divf %158, %159 : vector<8x32xf32>
      %161 = arith.mulf %152, %154 : vector<8x32xf32>
      %162 = math.tanh %161 : vector<8x32xf32>
      %163 = arith.mulf %160, %162 : vector<8x32xf32>
      %c0_43 = arith.constant 0 : index
      %c0_44 = arith.constant 0 : index
      %164 = vector.load %arg4[%c0_43, %c0_44] : memref<64x3xbf16, #tpu.memory_space<vmem>>, vector<64x3xbf16>
      %165 = arith.truncf %135 : vector<8x32xf32> to vector<8x32xbf16>
      %166 = vector.extract_strided_slice %164 {offsets = [0, 0], sizes = [32, 3], strides = [1, 1]} : vector<64x3xbf16> to vector<32x3xbf16>
      %cst_45 = arith.constant dense<0.000000e+00> : vector<8x3xf32>
      %167 = tpu.matmul %165, %166, %cst_45 {dimension_numbers = #tpu.dot_dimension_numbers<[1], [0], [0], [1], [0, 0, 1, 1], [], []>} : vector<8x32xbf16>, vector<32x3xbf16>, vector<8x3xf32> -> vector<8x3xf32>
      %168 = arith.truncf %163 : vector<8x32xf32> to vector<8x32xbf16>
      %169 = vector.extract_strided_slice %164 {offsets = [32, 0], sizes = [32, 3], strides = [1, 1]} : vector<64x3xbf16> to vector<32x3xbf16>
      %cst_46 = arith.constant dense<0.000000e+00> : vector<8x3xf32>
      %170 = tpu.matmul %168, %169, %cst_46 {dimension_numbers = #tpu.dot_dimension_numbers<[1], [0], [0], [1], [0, 0, 1, 1], [], []>} : vector<8x32xbf16>, vector<32x3xbf16>, vector<8x3xf32> -> vector<8x3xf32>
      %171 = arith.addf %167, %170 : vector<8x3xf32>
      %c0_47 = arith.constant 0 : index
      %c0_48 = arith.constant 0 : index
      %172 = vector.load %arg5[%c0_47, %c0_48] : memref<1x3xf32, #tpu.memory_space<vmem>>, vector<1x3xf32>
      %173 = vector.broadcast %172 : vector<1x3xf32> to vector<8x3xf32>
      %174 = arith.addf %171, %173 : vector<8x3xf32>
      %c0_49 = arith.constant 0 : index
      %c0_50 = arith.constant 0 : index
      %175 = vector.load %arg6[%c0_49, %c0_50] : memref<8x3xf32, #tpu.memory_space<vmem>>, vector<8x3xf32>
      tpu.vector_store %arg6[%c0_49, %c0_50], %174 {strides = array<i32>} : memref<8x3xf32, #tpu.memory_space<vmem>>, vector<8x3xf32>,
    } else {
    }
    return
  }
  func.func @transform_0(%arg0: i32) -> (i32, i32, i32) {
    %c0_i32 = arith.constant 0 : i32
    %c0_i32_0 = arith.constant 0 : i32
    %c0_i32_1 = arith.constant 0 : i32
    return %arg0, %c0_i32, %c0_i32_0 : i32, i32, i32
  }
  func.func @transform_1(%arg0: i32) -> (i32, i32) {
    %c0_i32 = arith.constant 0 : i32
    %c0_i32_0 = arith.constant 0 : i32
    %c0_i32_1 = arith.constant 0 : i32
    return %c0_i32, %c0_i32_0 : i32, i32
  }
  func.func @transform_2(%arg0: i32) -> (i32, i32) {
    %c0_i32 = arith.constant 0 : i32
    %c0_i32_0 = arith.constant 0 : i32
    %c0_i32_1 = arith.constant 0 : i32
    return %c0_i32, %c0_i32_0 : i32, i32
  }
  func.func @transform_3(%arg0: i32) -> (i32, i32) {
    %c0_i32 = arith.constant 0 : i32
    %c0_i32_0 = arith.constant 0 : i32
    %c0_i32_1 = arith.constant 0 : i32
    return %c0_i32, %c0_i32_0 : i32, i32
  }
  func.func @transform_4(%arg0: i32) -> (i32, i32) {
    %c0_i32 = arith.constant 0 : i32
    %c0_i32_0 = arith.constant 0 : i32
    %c0_i32_1 = arith.constant 0 : i32
    return %c0_i32, %c0_i32_0 : i32, i32
  }
  func.func @transform_5(%arg0: i32) -> (i32, i32) {
    %c0_i32 = arith.constant 0 : i32
    %c0_i32_0 = arith.constant 0 : i32
    %c0_i32_1 = arith.constant 0 : i32
    return %c0_i32, %c0_i32_0 : i32, i32
  }
}

</mosaic_0001>

<bundles_post_ra>
// kernel: bilstm_forward.2
= control target key start
LH: loop header
LB: loop body
LE: loop exit
PB: predicated region body
PF: predicated region fallthrough
CT: control target
= control target key end

     0   :  { %s1388_s18 = smov 0   ;;  %s1609_s0 = inlined_call_operand.vmem [shape: bf16[8,8,128], index: 0, kind: input, shape index: {}]   ;;  %s1610_s1 = inlined_call_operand.vmem [shape: bf16[8,8,128], index: 1, kind: input, shape index: {}]   ;;  %s1611_s2 = inlined_call_operand.vmem [shape: bf16[32,128], index: 2, kind: input, shape index: {}]   ;;  %s1612_s3 = inlined_call_operand.vmem [shape: bf16[32,128], index: 3, kind: input, shape index: {}]   ;;  %s1613_s4 = inlined_call_operand.vmem [shape: bf16[8,8,32], index: 4, kind: output, shape index: {0}]   ;;  %s1614_s5 = inlined_call_operand.vmem [shape: bf16[8,8,32], index: 5, kind: output, shape index: {1}]  }
   0x1 LB: > { %s1110_s19 = sadd.s32 4294967295, %s1350_s18   ;;  %p1114_p0 = scmp.ge.s32.totalorder %s1350_s18, 1  ;;  %s1350_s18 = sphi %s1388_s18, %s16_s18  }
   0x2   : > { %p208_p1 = scmp.lt.s32.totalorder %s1350_s18, 3 }
   0x4   : > { %p209_p2 = pnand %p1114_p0, %p208_p1 }
   0x5   : > { %s1115_s20 = sshll.u32 (!%p209_p2), %s1110_s19, 2  ;;  %s254_s21 = ssub.s32 (!%p209_p2), 1, %s1110_s19 }
   0x6   : > { %212 = sbr.rel (%p209_p2) target bundleno = 2805 (0xaf5), region = 36  ;;  %p249_p3 = scmp.lt.s32.totalorder (!%p209_p2), %s1115_s20, 7 }
   0x7   : > { %s1117_s22 = sshll.u32 (!%p209_p2), %s254_s21, 2  ;;  %p1123_p5 = scmp.ne.s32.totalorder (!%p209_p2), %s1110_s19, 0 }
   0x8   : > { %p256_p4 = scmp.lt.s32.totalorder (!%p209_p2), %s1117_s22, 7 }
   0xb   : > { %s1616_s20 = smov (!%p249_p3, %s1115_s20), 7  ;;  %s1618_s22 = smov (!%p256_p4, %s1117_s22), 7 }
   0xc   : > { %s1116_s23 = sshll.u32 %s1616_s20, 2  ;;  %s1118_s27 = sshll.u32 %s1618_s22, 2 }
   0xd   : > { %s1399_s26 = scalar_lea.vmem %s1609_s0, %s1116_s23  ;;  %s1404_s30 = scalar_lea.vmem %s1610_s1, %s1118_s27 }
   0xe   : > { %s1409_s8 = scalar_lea.vmem %s1613_s4, %s1116_s23  ;;  %s1414_s11 = scalar_lea.vmem %s1614_s5, %s1118_s27 }
   0xf   : > { %280 = sbr.rel (%p1123_p5) target bundleno = 23 (0x17), region = 40 }
  0x14   : > { %vm281_vm0 = vcmask 261120   ;;  %v1352_v0 = vmov 0.0  }
  0x15   : > { %282 = vst.msk [vmem:[#allocation2] sm:$0xff] %vm281_vm0, %v1352_v0  ;;  %283 = vst.msk [vmem:[#allocation2 + $0x8] sm:$0xff] %vm281_vm0, %v1352_v0 }
  0x16   : > { %284 = vst.msk [vmem:[#allocation2 + $0x10] sm:$0xff] %vm281_vm0, %v1352_v0  ;;  %285 = vst.msk [vmem:[#allocation2 + $0x18] sm:$0xff] %vm281_vm0, %v1352_v0 }
  0x17 PF: > { %v1419_v1 = vld [vmem:[%s1611_s2 + $0x8] sm:$0xff]   ;;  %v1353_v2 = vmov 0.0   ;;  %v1432_v4 = vld [vmem:[%s1611_s2] sm:$0xff]   ;;  %vm1354_vm1 = vmmov 0   ;;  %s1355_s21 = smov 32   ;;  %vm316_vm2 = vcmask 261120  }
  0x18   : > { %1198 = vmatprep.subr.bf16.mxu0 %v1353_v2  ;;  %1206 = vmatprep.subr.bf16.mxu1 %v1353_v2  ;;  %v1426_v3 = vld [vmem:[%s1612_s3 + $0x8] sm:$0xff]   ;;  %v1441_v5 = vld [vmem:[%s1612_s3] sm:$0xff]   ;;  %s1356_s22 = smov 64   ;;  %s1357_s23 = smov 96   ;;  %vm484_vm3 = vcmask 257024  }
  0x19   : > { %1199 = vmatpush3.bf16.msra.mxu0 %v1419_v1  ;;  %1202 = vmatprep.mubr.msk.bf16.mxu0 %vm1354_vm1, %v1353_v2  ;;  %v1467_v12 = vld [vmem:[%s1399_s26] sm:$0xff]   ;;  %v1470_v13 = vld [vmem:[%s1404_s30 + $0x8] sm:$0xff]  }
  0x1a   : > { %1207 = vmatpush3.bf16.msra.mxu1 %v1426_v3  ;;  %1200 = vmatprep.subr.bf16.mxu0 %v1353_v2  ;;  %v302_v14 = vunpack.c.l.bf16 %v1467_v12  ;;  %v363_v15 = vunpack.c.h.bf16 %v1470_v13  ;;  %v497_v58 = vunpack.c.h.bf16 %v1467_v12  ;;  %v546_v61 = vunpack.c.l.bf16 %v1470_v13 }
  0x1b   : > { %1208 = vmatprep.subr.bf16.mxu1 %v1353_v2  ;;  %1210 = vmatprep.mubr.msk.bf16.mxu1 %vm1354_vm1, %v1353_v2 }
  0x1c   : > { %v294_v6 = vld [vmem:[#allocation2] sm:$0xff]  ;;  %v296_v8 = vld [vmem:[#allocation2 + $0x8] sm:$0xff] }
  0x1d   : > { %v298_v7 = vld [vmem:[#allocation2 + $0x10] sm:$0xff]  ;;  %v303_v9 = vpack.c.bf16 %v294_v6, %v294_v6  ;;  %429 = vrot.lane.b32.xlu1 %v296_v8, %s1355_s21  ;;  %1201 = vmatpush3.bf16.msra.mxu0 %v1432_v4  ;;  %v300_v11 = vld [vmem:[#allocation2 + $0x18] sm:$0xff] }
  0x1e   : > { %v364_v10 = vpack.c.bf16 %v298_v7, %v298_v7  ;;  %1209 = vmatpush3.bf16.msra.mxu1 %v1441_v5  ;;  %1214 = vmatprep.subr.bf16.mxu0 %v1353_v2 }
  0x1f   : > { %1222 = vmatprep.subr.bf16.mxu1 %v1353_v2 }
  0x20   : > { %1203 = vmatmul.mubr.msk.bf16.vlgmr.msra.gmra.mxu0 %vm316_vm2, %v303_v9 }
  0x21   : > { %457 = vrot.lane.b32.xlu1 %v300_v11, %s1355_s21  ;;  %1211 = vmatmul.mubr.msk.bf16.vlgmr.msra.gmra.mxu1 %vm316_vm2, %v364_v10 }
  0x22   : > { %1215 = vmatpush3.bf16.msra.mxu0 %v1419_v1  ;;  %1223 = vmatpush3.bf16.msra.mxu1 %v1426_v3 }
  0x23   : > { %1216 = vmatprep.subr.bf16.mxu0 %v1353_v2  ;;  %1218 = vmatprep.mubr.msk.bf16.mxu0 %vm1354_vm1, %v1353_v2 }
  0x24   : > { %1224 = vmatprep.subr.bf16.mxu1 %v1353_v2  ;;  %1226 = vmatprep.mubr.msk.bf16.mxu1 %vm1354_vm1, %v1353_v2 }
  0x26   : > { %1217 = vmatpush3.bf16.msra.mxu0 %v1432_v4  ;;  %1225 = vmatpush3.bf16.msra.mxu1 %v1441_v5 }
  0x27   : > { %1230 = vmatprep.subr.bf16.mxu0 %v1353_v2  ;;  %1238 = vmatprep.subr.bf16.mxu1 %v1353_v2 }
  0x8f   : > { %v430_v40 = vpop.permute.xlu1 %429 }
  0x93   : > { %v458_v42 = vpop.permute.xlu1 %457 }
  0xe0   : > { %v354_v16 = vpop.f32.mrf.mxu0 }
  0xe1   : > { %v360_v17 = vadd.f32 %v354_v16, %v302_v14  ;;  %v414_v18 = vpop.f32.mrf.mxu1 }
  0xe2   : > { %v420_v19 = vadd.f32 %v414_v18, %v363_v15  ;;  %v1204_v20 = vpop.f32.mrf.mxu0 }
  0xe3   : > { %1280 = vtanh.f32 %v360_v17  ;;  %v1212_v21 = vpop.f32.mrf.mxu1  ;;  %v1131_v28 = vmul.f32 -1.442695, %v360_v17 }
  0xe4   : > { %v357_v22 = vpop.f32.mrf.mxu0  ;;  %1282 = vtanh.f32 %v420_v19  ;;  %v1132_v29 = vmul.f32 -1.442695, %v420_v19 }
  0xe5   : > { %v417_v23 = vpop.f32.mrf.mxu1  ;;  %1284 = vpow2.f32 %v1131_v28 }
  0xe6   : > { %v1205_v24 = vpop.f32.mrf.mxu0  ;;  %1286 = vpow2.f32 %v1132_v29 }
  0xe7   : > { %v1213_v25 = vpop.f32.mrf.mxu1 }
  0xf0   : > { %v1281_v26 = vpop.eup %1280 }
  0xf1   : > { %434 = vrot.lane.b32.xlu0 %v1281_v26, %s1356_s22  ;;  %v1283_v27 = vpop.eup %1282 }
  0xf2   : > { %v1285_v30 = vpop.eup %1284 }
  0xf3   : > { %v424_v31 = vadd.f32 1.0, %v1285_v30  ;;  %v1287_v32 = vpop.eup %1286 }
  0xf4   : > { %v452_v33 = vadd.f32 1.0, %v1287_v32 }
  0xf5   : > { %462 = vrot.lane.b32.xlu0 %v1283_v27, %s1356_s22  ;;  %1288 = vrcp.f32 %v424_v31 }
  0xf6   : > { %1290 = vrcp.f32 %v452_v33 }
 0x102   : > { %v1289_v34 = vpop.eup %1288 }
 0x103   : > { %v1291_v37 = vpop.eup %1290  ;;  %v432_v41 = vmul.f32 %v1289_v34, %v430_v40 }
 0x104   : > { %v460_v45 = vmul.f32 %v1291_v37, %v458_v42  ;;  %v1549_v42 = vld [vmem:[%s1404_s30] sm:$0xff]  }
 0x163   : > { %v435_v35 = vpop.permute.xlu0 %434 }
 0x164   : > { %v437_v36 = vmul.f32 %v1289_v34, %v435_v35 }
 0x166   : > { %439 = vrot.lane.b32.xlu0 %v437_v36, %s1355_s21 }
 0x167   : > { %v463_v38 = vpop.permute.xlu0 %462 }
 0x168   : > { %v465_v39 = vmul.f32 %v1291_v37, %v463_v38 }
 0x16a   : > { %467 = vrot.lane.b32.xlu1 %v465_v39, %s1355_s21 }
 0x1d8   : > { %v440_v43 = vpop.permute.xlu0 %439 }
 0x1d9   : > { %v1478_v44 = vadd.f32 %v440_v43, %v432_v41 }
 0x1db   : > { %1292 = vtanh.f32 %v1478_v44 }
 0x1dc   : > { %v468_v46 = vpop.permute.xlu1 %467 }
 0x1dd   : > { %v1481_v47 = vadd.f32 %v468_v46, %v460_v45  ;;  %v710_v45 = vunpack.c.h.bf16 %v1549_v42 }
 0x1df   : > { %1294 = vtanh.f32 %v1481_v47 }
 0x1e8   : > { %v1293_v48 = vpop.eup %1292 }
 0x1e9   : > { %445 = vrot.lane.b32.xlu0 %v1293_v48, %s1356_s22 }
 0x1ec   : > { %v1295_v49 = vpop.eup %1294 }
 0x1ed   : > { %473 = vrot.lane.b32.xlu1 %v1295_v49, %s1356_s22 }
 0x25b   : > { %v446_v50 = vpop.permute.xlu0 %445 }
 0x25c   : > { %v448_v51 = vmul.f32 %v1289_v34, %v446_v50 }
 0x25e   : > { %v1486_v52 = vpack.c.bf16 %v448_v51, %v448_v51 }
 0x25f   : > { %v474_v53 = vpop.permute.xlu1 %473 }
 0x260   : > { %v476_v54 = vmul.f32 %v1291_v37, %v474_v53  ;;  %498 = vrot.lane.b32.xlu0 %v1486_v52, %s1355_s21 }
 0x262   : > { %v1490_v55 = vpack.c.bf16 %v476_v54, %v476_v54 }
 0x264   : > { %547 = vrot.lane.b32.xlu1 %v1490_v55, %s1355_s21 }
 0x2d2   : > { %v499_v56 = vpop.permute.xlu0 %498 }
 0x2d3   : > { %1219 = vmatmul.mubr.msk.bf16.vlgmr.msra.gmra.mxu0 %vm316_vm2, %v499_v56 }
 0x2d4   : > { %1231 = vmatpush3.bf16.msra.mxu0 %v1419_v1  ;;  %1234 = vmatprep.mubr.msk.bf16.mxu0 %vm1354_vm1, %v1353_v2 }
 0x2d5   : > { %1232 = vmatprep.subr.bf16.mxu0 %v1353_v2 }
 0x2d6   : > { %v548_v57 = vpop.permute.xlu1 %547 }
 0x2d7   : > { %1227 = vmatmul.mubr.msk.bf16.vlgmr.msra.gmra.mxu1 %vm316_vm2, %v548_v57 }
 0x2d8   : > { %1239 = vmatpush3.bf16.msra.mxu1 %v1426_v3  ;;  %1233 = vmatpush3.bf16.msra.mxu0 %v1432_v4 }
 0x2d9   : > { %1240 = vmatprep.subr.bf16.mxu1 %v1353_v2  ;;  %1242 = vmatprep.mubr.msk.bf16.mxu1 %vm1354_vm1, %v1353_v2 }
 0x2da   : > { %1246 = vmatprep.subr.bf16.mxu0 %v1353_v2 }
 0x2dc   : > { %1241 = vmatpush3.bf16.msra.mxu1 %v1441_v5 }
 0x2dd   : > { %1254 = vmatprep.subr.bf16.mxu1 %v1353_v2 }
 0x393   : > { %v537_v59 = vpop.f32.mrf.mxu0 }
 0x394   : > { %v543_v60 = vadd.f32 %v537_v59, %v497_v58 }
 0x395   : > { %v1220_v62 = vpop.f32.mrf.mxu0 }
 0x396   : > { %1296 = vtanh.f32 %v543_v60  ;;  %v1140_v12 = vmul.f32 -1.442695, %v543_v60 }
 0x397   : > { %v540_v63 = vpop.f32.mrf.mxu0  ;;  %v586_v0 = vpop.f32.mrf.mxu1 }
 0x398   : > { %v592_v6 = vadd.f32 %v586_v0, %v546_v61 }
 0x399   : > { %v1221_v7 = vpop.f32.mrf.mxu0  ;;  %v1228_v8 = vpop.f32.mrf.mxu1 }
 0x39a   : > { %1298 = vtanh.f32 %v592_v6  ;;  %v1141_v15 = vmul.f32 -1.442695, %v592_v6 }
 0x39b   : > { %v589_v9 = vpop.f32.mrf.mxu1  ;;  %1300 = vpow2.f32 %v1140_v12 }
 0x39c   : > { %1302 = vpow2.f32 %v1141_v15 }
 0x39d   : > { %v1229_v10 = vpop.f32.mrf.mxu1 }
 0x3a3   : > { %v1297_v11 = vpop.eup %1296 }
 0x3a4   : > { %602 = vrot.lane.b32.xlu0 %v1297_v11, %s1356_s22 }
 0x3a7   : > { %v1299_v14 = vpop.eup %1298 }
 0x3a8   : > { %626 = vrot.lane.b32.xlu1 %v1299_v14, %s1356_s22  ;;  %v1301_v13 = vpop.eup %1300 }
 0x3a9   : > { %v596_v16 = vadd.f32 1.0, %v1301_v13  ;;  %v1303_v17 = vpop.eup %1302 }
 0x3aa   : > { %v620_v18 = vadd.f32 1.0, %v1303_v17 }
 0x3ab   : > { %1304 = vrcp.f32 %v596_v16 }
 0x3ac   : > { %1306 = vrcp.f32 %v620_v18 }
 0x3b8   : > { %v1305_v19 = vpop.eup %1304 }
 0x3b9   : > { %v1307_v22 = vpop.eup %1306  ;;  %v600_v25 = vmul.f32 %v1305_v19, %v1478_v44 }
 0x3ba   : > { %v624_v28 = vmul.f32 %v1307_v22, %v1481_v47 }
 0x416   : > { %v603_v20 = vpop.permute.xlu0 %602 }
 0x417   : > { %v605_v21 = vmul.f32 %v1305_v19, %v603_v20 }
 0x419   : > { %607 = vrot.lane.b32.xlu0 %v605_v21, %s1355_s21 }
 0x41a   : > { %v627_v23 = vpop.permute.xlu1 %626 }
 0x41b   : > { %v629_v24 = vmul.f32 %v1307_v22, %v627_v23 }
 0x41d   : > { %631 = vrot.lane.b32.xlu1 %v629_v24, %s1355_s21 }
 0x48b   : > { %v608_v26 = vpop.permute.xlu0 %607 }
 0x48c   : > { %v1515_v27 = vadd.f32 %v608_v26, %v600_v25  ;;  %v873_v26 = vunpack.c.l.bf16 %v1549_v42 }
 0x48e   : > { %1308 = vtanh.f32 %v1515_v27 }
 0x48f   : > { %v632_v29 = vpop.permute.xlu1 %631 }
 0x490   : > { %v1519_v30 = vadd.f32 %v632_v29, %v624_v28 }
 0x492   : > { %1310 = vtanh.f32 %v1519_v30 }
 0x49b   : > { %v1309_v31 = vpop.eup %1308 }
 0x49c   : > { %613 = vrot.lane.b32.xlu0 %v1309_v31, %s1356_s22 }
 0x49f   : > { %v1311_v32 = vpop.eup %1310 }
 0x4a0   : > { %637 = vrot.lane.b32.xlu1 %v1311_v32, %s1356_s22 }
 0x50e   : > { %v614_v33 = vpop.permute.xlu0 %613 }
 0x50f   : > { %v616_v34 = vmul.f32 %v1305_v19, %v614_v33 }
 0x511   : > { %v1524_v35 = vpack.c.bf16 %v616_v34, %v616_v34 }
 0x512   : > { %v638_v36 = vpop.permute.xlu1 %637 }
 0x513   : > { %v640_v37 = vmul.f32 %v1307_v22, %v638_v36  ;;  %662 = vrot.lane.b32.xlu0 %v1524_v35, %s1355_s21 }
 0x515   : > { %v1528_v38 = vpack.c.bf16 %v640_v37, %v640_v37 }
 0x517   : > { %711 = vrot.lane.b32.xlu1 %v1528_v38, %s1355_s21 }
 0x585   : > { %v663_v39 = vpop.permute.xlu0 %662 }
 0x586   : > { %1235 = vmatmul.mubr.msk.bf16.vlgmr.msra.gmra.mxu0 %vm316_vm2, %v663_v39 }
 0x587   : > { %1247 = vmatpush3.bf16.msra.mxu0 %v1419_v1  ;;  %1250 = vmatprep.mubr.msk.bf16.mxu0 %vm1354_vm1, %v1353_v2  ;;  %v1545_v1 = vld [vmem:[%s1399_s26 + $0x8] sm:$0xff]  }
 0x588   : > { %1248 = vmatprep.subr.bf16.mxu0 %v1353_v2  ;;  %v661_v41 = vunpack.c.l.bf16 %v1545_v1  ;;  %v825_v23 = vunpack.c.h.bf16 %v1545_v1 }
 0x589   : > { %v712_v40 = vpop.permute.xlu1 %711 }
 0x58a   : > { %1243 = vmatmul.mubr.msk.bf16.vlgmr.msra.gmra.mxu1 %vm316_vm2, %v712_v40 }
 0x58b   : > { %1255 = vmatpush3.bf16.msra.mxu1 %v1426_v3  ;;  %1249 = vmatpush3.bf16.msra.mxu0 %v1432_v4 }
 0x58c   : > { %1256 = vmatprep.subr.bf16.mxu1 %v1353_v2  ;;  %1258 = vmatprep.mubr.msk.bf16.mxu1 %vm1354_vm1, %v1353_v2 }
 0x58f   : > { %1257 = vmatpush3.bf16.msra.mxu1 %v1441_v5 }
 0x646   : > { %v701_v43 = vpop.f32.mrf.mxu0 }
 0x647   : > { %v707_v44 = vadd.f32 %v701_v43, %v661_v41 }
 0x648   : > { %v1236_v3 = vpop.f32.mrf.mxu0 }
 0x649   : > { %1312 = vtanh.f32 %v707_v44  ;;  %v1150_v53 = vmul.f32 -1.442695, %v707_v44 }
 0x64a   : > { %v704_v4 = vpop.f32.mrf.mxu0  ;;  %v750_v46 = vpop.f32.mrf.mxu1 }
 0x64b   : > { %v756_v47 = vadd.f32 %v750_v46, %v710_v45 }
 0x64c   : > { %v1237_v48 = vpop.f32.mrf.mxu0  ;;  %v1244_v49 = vpop.f32.mrf.mxu1 }
 0x64d   : > { %1314 = vtanh.f32 %v756_v47  ;;  %v1151_v54 = vmul.f32 -1.442695, %v756_v47 }
 0x64e   : > { %v753_v2 = vpop.f32.mrf.mxu1  ;;  %1316 = vpow2.f32 %v1150_v53 }
 0x64f   : > { %1318 = vpow2.f32 %v1151_v54 }
 0x650   : > { %v1245_v5 = vpop.f32.mrf.mxu1 }
 0x656   : > { %v1313_v50 = vpop.eup %1312 }
 0x657   : > { %766 = vrot.lane.b32.xlu0 %v1313_v50, %s1356_s22 }
 0x65a   : > { %v1315_v51 = vpop.eup %1314 }
 0x65b   : > { %790 = vrot.lane.b32.xlu1 %v1315_v51, %s1356_s22  ;;  %v1317_v56 = vpop.eup %1316 }
 0x65c   : > { %v760_v57 = vadd.f32 1.0, %v1317_v56  ;;  %v1319_v58 = vpop.eup %1318 }
 0x65d   : > { %v784_v59 = vadd.f32 1.0, %v1319_v58 }
 0x65e   : > { %1320 = vrcp.f32 %v760_v57 }
 0x65f   : > { %1322 = vrcp.f32 %v784_v59 }
 0x66b   : > { %v1321_v60 = vpop.eup %1320 }
 0x66c   : > { %v1323_v63 = vpop.eup %1322  ;;  %v764_v7 = vmul.f32 %v1321_v60, %v1515_v27 }
 0x66d   : > { %v788_v10 = vmul.f32 %v1323_v63, %v1519_v30 }
 0x6c9   : > { %v767_v61 = vpop.permute.xlu0 %766 }
 0x6ca   : > { %v769_v62 = vmul.f32 %v1321_v60, %v767_v61 }
 0x6cc   : > { %771 = vrot.lane.b32.xlu0 %v769_v62, %s1355_s21 }
 0x6cd   : > { %v791_v0 = vpop.permute.xlu1 %790 }
 0x6ce   : > { %v793_v6 = vmul.f32 %v1323_v63, %v791_v0 }
 0x6d0   : > { %795 = vrot.lane.b32.xlu1 %v793_v6, %s1355_s21 }
 0x73e   : > { %v772_v8 = vpop.permute.xlu0 %771 }
 0x73f   : > { %v774_v9 = vadd.f32 %v772_v8, %v764_v7 }
 0x741   : > { %1324 = vtanh.f32 %v774_v9 }
 0x742   : > { %v796_v11 = vpop.permute.xlu1 %795 }
 0x743   : > { %v798_v14 = vadd.f32 %v796_v11, %v788_v10 }
 0x745   : > { %1326 = vtanh.f32 %v798_v14 }
 0x74e   : > { %v1325_v12 = vpop.eup %1324 }
 0x74f   : > { %777 = vrot.lane.b32.xlu0 %v1325_v12, %s1356_s22 }
 0x752   : > { %v1327_v15 = vpop.eup %1326 }
 0x753   : > { %801 = vrot.lane.b32.xlu1 %v1327_v15, %s1356_s22 }
 0x7c1   : > { %v778_v13 = vpop.permute.xlu0 %777 }
 0x7c2   : > { %v780_v16 = vmul.f32 %v1321_v60, %v778_v13 }
 0x7c4   : > { %v805_v17 = vpack.c.bf16 %v780_v16, %v780_v16 }
 0x7c5   : > { %v802_v18 = vpop.permute.xlu1 %801 }
 0x7c6   : > { %v804_v19 = vmul.f32 %v1323_v63, %v802_v18  ;;  %826 = vrot.lane.b32.xlu0 %v805_v17, %s1355_s21 }
 0x7c8   : > { %v814_v20 = vpack.c.bf16 %v804_v19, %v804_v19 }
 0x7ca   : > { %874 = vrot.lane.b32.xlu1 %v814_v20, %s1355_s21 }
 0x838   : > { %v827_v21 = vpop.permute.xlu0 %826 }
 0x839   : > { %1251 = vmatmul.mubr.msk.bf16.vlgmr.msra.gmra.mxu0 %vm316_vm2, %v827_v21 }
 0x83c   : > { %v875_v22 = vpop.permute.xlu1 %874 }
 0x83d   : > { %1259 = vmatmul.mubr.msk.bf16.vlgmr.msra.gmra.mxu1 %vm316_vm2, %v875_v22 }
 0x8f9   : > { %v865_v24 = vpop.f32.mrf.mxu0 }
 0x8fa   : > { %v871_v25 = vadd.f32 %v865_v24, %v825_v23 }
 0x8fb   : > { %v1252_v27 = vpop.f32.mrf.mxu0 }
 0x8fc   : > { %1328 = vtanh.f32 %v871_v25  ;;  %v1159_v39 = vmul.f32 -1.442695, %v871_v25 }
 0x8fd   : > { %v868_v28 = vpop.f32.mrf.mxu0  ;;  %v913_v29 = vpop.f32.mrf.mxu1 }
 0x8fe   : > { %v919_v30 = vadd.f32 %v913_v29, %v873_v26 }
 0x8ff   : > { %v1253_v31 = vpop.f32.mrf.mxu0  ;;  %v1260_v32 = vpop.f32.mrf.mxu1 }
 0x900   : > { %1330 = vtanh.f32 %v919_v30  ;;  %v1160_v40 = vmul.f32 -1.442695, %v919_v30 }
 0x901   : > { %v916_v33 = vpop.f32.mrf.mxu1  ;;  %1332 = vpow2.f32 %v1159_v39 }
 0x902   : > { %1334 = vpow2.f32 %v1160_v40 }
 0x903   : > { %v1261_v34 = vpop.f32.mrf.mxu1 }
 0x909   : > { %v1329_v36 = vpop.eup %1328 }
 0x90a   : > { %929 = vrot.lane.b32.xlu0 %v1329_v36, %s1356_s22 }
 0x90d   : > { %v1331_v37 = vpop.eup %1330 }
 0x90e   : > { %953 = vrot.lane.b32.xlu1 %v1331_v37, %s1356_s22  ;;  %v1333_v1 = vpop.eup %1332 }
 0x90f   : > { %v923_v41 = vadd.f32 1.0, %v1333_v1  ;;  %v1335_v42 = vpop.eup %1334 }
 0x910   : > { %v947_v43 = vadd.f32 1.0, %v1335_v42 }
 0x911   : > { %1336 = vrcp.f32 %v923_v41 }
 0x912   : > { %1338 = vrcp.f32 %v947_v43 }
 0x91e   : > { %v1337_v44 = vpop.eup %1336 }
 0x91f   : > { %v1339_v4 = vpop.eup %1338  ;;  %v927_v48 = vmul.f32 %v1337_v44, %v774_v9 }
 0x920   : > { %v951_v5 = vmul.f32 %v1339_v4, %v798_v14 }
 0x97c   : > { %v930_v45 = vpop.permute.xlu0 %929 }
 0x97d   : > { %v932_v3 = vmul.f32 %v1337_v44, %v930_v45 }
 0x97f   : > { %934 = vrot.lane.b32.xlu0 %v932_v3, %s1355_s21 }
 0x980   : > { %v954_v46 = vpop.permute.xlu1 %953 }
 0x981   : > { %v956_v47 = vmul.f32 %v1339_v4, %v954_v46 }
 0x983   : > { %958 = vrot.lane.b32.xlu1 %v956_v47, %s1355_s21 }
 0x9f1   : > { %v935_v49 = vpop.permute.xlu0 %934 }
 0x9f2   : > { %v937_v2 = vadd.f32 %v935_v49, %v927_v48 }
 0x9f4   : > { %1340 = vtanh.f32 %v937_v2 }
 0x9f5   : > { %v959_v50 = vpop.permute.xlu1 %958 }
 0x9f6   : > { %v961_v51 = vadd.f32 %v959_v50, %v951_v5 }
 0x9f8   : > { %1342 = vtanh.f32 %v961_v51 }
 0xa01   : > { %v1341_v53 = vpop.eup %1340 }
 0xa02   : > { %940 = vrot.lane.b32.xlu0 %v1341_v53, %s1356_s22 }
 0xa05   : > { %v1343_v54 = vpop.eup %1342 }
 0xa06   : > { %964 = vrot.lane.b32.xlu1 %v1343_v54, %s1356_s22  ;;  %481 = vrot.lane.b32.xlu0 %v1486_v52, %s1355_s21 }
 0xa0a   : > { %490 = vrot.lane.b32.xlu1 %v1490_v55, %s1355_s21  ;;  %645 = vrot.lane.b32.xlu0 %v1524_v35, %s1355_s21 }
 0xa0e   : > { %654 = vrot.lane.b32.xlu1 %v1528_v38, %s1355_s21  ;;  %809 = vrot.lane.b32.xlu0 %v805_v17, %s1355_s21 }
 0xa12   : > { %818 = vrot.lane.b32.xlu1 %v814_v20, %s1355_s21 }
 0xa16   : > { %991 = vrot.lane.b32.xlu1 %v937_v2, %s1357_s23 }
 0xa74   : > { %v941_v56 = vpop.permute.xlu0 %940 }
 0xa75   : > { %v943_v52 = vmul.f32 %v1337_v44, %v941_v56 }
 0xa77   : > { %986 = vrot.lane.b32.xlu0 %v943_v52, %s1355_s21  ;;  %v1172_v57 = vpack.c.bf16 %v943_v52, %v943_v52 }
 0xa78   : > { %v965_v55 = vpop.permute.xlu1 %964  ;;  %v482_v35 = vpop.permute.xlu0 %481 }
 0xa79   : > { %v967_v58 = vmul.f32 %v1339_v4, %v965_v55  ;;  %485 = vst.msk [vmem:[%s1409_s8] sm:$0xf] %vm484_vm3, %v482_v35 }
 0xa7b   : > { %v1173_v38 = vpack.c.bf16 %v967_v58, %v967_v58  ;;  %972 = vrot.lane.b32.xlu0 %v1172_v57, %s1355_s21 }
 0xa7c   : > { %v491_v59 = vpop.permute.xlu1 %490  ;;  %v646_v60 = vpop.permute.xlu0 %645 }
 0xa7d   : > { %1135 = vst.msk [vmem:[%s1414_s11 + $0xc] sm:$0xf] %vm484_vm3, %v491_v59  ;;  %1143 = vst.msk [vmem:[%s1409_s8 + $0x4] sm:$0xf] %vm484_vm3, %v646_v60  ;;  %981 = vrot.lane.b32.xlu1 %v1173_v38, %s1355_s21 }
 0xa7f   : > { %996 = vrot.lane.b32.xlu0 %v967_v58, %s1355_s21 }
 0xa80   : > { %v655_v61 = vpop.permute.xlu1 %654  ;;  %v810_v62 = vpop.permute.xlu0 %809 }
 0xa81   : > { %1145 = vst.msk [vmem:[%s1414_s11 + $0x8] sm:$0xf] %vm484_vm3, %v655_v61  ;;  %1153 = vst.msk [vmem:[%s1409_s8 + $0x8] sm:$0xf] %vm484_vm3, %v810_v62  ;;  %1001 = vrot.lane.b32.xlu1 %v961_v51, %s1357_s23 }
 0xa84   : > { %v819_v63 = vpop.permute.xlu1 %818 }
 0xa85   : > { %1155 = vst.msk [vmem:[%s1414_s11 + $0x4] sm:$0xf] %vm484_vm3, %v819_v63 }
 0xa88   : > { %v992_v0 = vpop.permute.xlu1 %991 }
 0xa89   : > { %994 = vst.msk [vmem:[#allocation2 + $0x8] sm:$0xff] %vm316_vm2, %v992_v0 }
 0xae9   : > { %v987_v6 = vpop.permute.xlu0 %986 }
 0xaea   : > { %989 = vst.msk [vmem:[#allocation2] sm:$0xff] %vm316_vm2, %v987_v6 }
 0xaed   : > { %v973_v7 = vpop.permute.xlu0 %972 }
 0xaee   : > { %1162 = vst.msk [vmem:[%s1409_s8 + $0xc] sm:$0xf] %vm484_vm3, %v973_v7 }
 0xaef   : > { %v982_v8 = vpop.permute.xlu1 %981 }
 0xaf0   : > { %984 = vst.msk [vmem:[%s1414_s11] sm:$0xf] %vm484_vm3, %v982_v8 }
 0xaf1   : > { %v997_v9 = vpop.permute.xlu0 %996 }
 0xaf2   : > { %999 = vst.msk [vmem:[#allocation2 + $0x10] sm:$0xff] %vm316_vm2, %v997_v9 }
 0xaf3   : > { %v1002_v10 = vpop.permute.xlu1 %1001 }
 0xaf4   : > { %1004 = vst.msk [vmem:[#allocation2 + $0x18] sm:$0xff] %vm316_vm2, %v1002_v10 }
 0xaf5 PF: > { %s16_s18 = sadd.s32 1, %s1350_s18  }
 0xaf6   : > { %p13_p6 = scmp.ge.s32.totalorder %s16_s18, 4  }
 0xaf8   :  { %15 = sbr.rel (!%p13_p6) target bundleno = 1 (0x1), region = 100 }

// kernel: bilstm_forward.3
= control target key start
LH: loop header
LB: loop body
LE: loop exit
PB: predicated region body
PF: predicated region fallthrough
CT: control target
= control target key end

     0   :  { %s949_s18 = smov 0   ;;  %s1028_s0 = inlined_call_operand.vmem [shape: bf16[8,8,128], index: 0, kind: input, shape index: {}]   ;;  %s1029_s1 = inlined_call_operand.vmem [shape: bf16[8,128], index: 1, kind: input, shape index: {}]   ;;  %s1030_s2 = inlined_call_operand.vmem [shape: bf16[32,128], index: 2, kind: input, shape index: {}]   ;;  %s1031_s3 = inlined_call_operand.vmem [shape: bf16[64,3], index: 3, kind: input, shape index: {}]   ;;  %s1032_s4 = inlined_call_operand.vmem [shape: f32[1,3], index: 4, kind: input, shape index: {}]   ;;  %s1033_s5 = inlined_call_operand.vmem [shape: f32[8,3], index: 5, kind: output, shape index: {}]  }
   0x1 LB: > { %s955_s19 = sadd.s32 4294967295, %s906_s18   ;;  %p741_p0 = scmp.ge.s32.totalorder %s906_s18, 1  ;;  %s906_s18 = sphi %s949_s18, %s15_s18  }
   0x2   : > { %p183_p1 = scmp.lt.s32.totalorder %s906_s18, 3 }
   0x4   : > { %p184_p2 = pnand %p741_p0, %p183_p1 }
   0x5   : > { %s742_s20 = sshll.u32 (!%p184_p2), %s955_s19, 2  ;;  %p744_p4 = scmp.ne.s32.totalorder (!%p184_p2), %s955_s19, 0 }
   0x6   : > { %187 = sbr.rel (%p184_p2) target bundleno = 3375 (0xd2f), region = 40  ;;  %p207_p3 = scmp.lt.s32.totalorder (!%p184_p2), %s742_s20, 7 }
   0xb   : > { %s1035_s20 = smov (!%p207_p3, %s742_s20), 7  ;;  %216 = sbr.rel (%p744_p4) target bundleno = 18 (0x12), region = 44 }
   0xc   : > { %s743_s21 = sshll.u32 %s1035_s20, 2 }
   0xd   : > { %s963_s24 = scalar_lea.vmem %s1028_s0, %s743_s21 }
  0x10   : > { %vm217_vm0 = vcmask 261120   ;;  %v908_v0 = vmov 0.0  }
  0x11   : > { %218 = vst.msk [vmem:[#allocation2] sm:$0xff] %vm217_vm0, %v908_v0  ;;  %219 = vst.msk [vmem:[#allocation2 + $0x8] sm:$0xff] %vm217_vm0, %v908_v0 }
  0x12 PF: > { %v854_v1 = vld [vmem:[%s1030_s2 + $0x8] sm:$0xff]   ;;  %v909_v2 = vmov 0.0   ;;  %v855_v3 = vld [vmem:[%s1030_s2] sm:$0xff]   ;;  %vm910_vm1 = vmmov 0   ;;  %vm242_vm2 = vcmask 261120   ;;  %s911_s29 = smov 64  }
  0x13   : > { %787 = vmatprep.subr.bf16.mxu0 %v909_v2  ;;  %795 = vmatprep.subr.bf16.mxu1 %v909_v2  ;;  %v227_v6 = vld [vmem:[%s963_s24] sm:$0xff]   ;;  %s912_s30 = smov 32   ;;  %v752_v51 = vld [vmem:[%s963_s24 + $0x8] sm:$0xff]   ;;  %s913_s6 = smov 96  }
  0x14   : > { %788 = vmatpush3.bf16.msra.mxu0 %v854_v1  ;;  %791 = vmatprep.mubr.msk.bf16.mxu0 %vm910_vm1, %v909_v2  ;;  %v228_v7 = vunpack.c.l.bf16 %v227_v6  ;;  %v317_v30 = vunpack.c.h.bf16 %v227_v6  ;;  %v392_v52 = vunpack.c.l.bf16 %v752_v51  ;;  %p758_p5 = scmp.ne.s32.totalorder %s955_s19, 1 }
  0x15   : > { %789 = vmatprep.subr.bf16.mxu0 %v909_v2  ;;  %796 = vmatpush3.bf16.msra.mxu1 %v854_v1  ;;  %s914_s9 = smov (!%p758_p5), 64   ;;  %s917_s16 = smov (!%p758_p5), 96  }
  0x16   : > { %797 = vmatprep.subr.bf16.mxu1 %v909_v2  ;;  %799 = vmatprep.mubr.msk.bf16.mxu1 %vm910_vm1, %v909_v2  ;;  %s918_s20 = smov (!%p758_p5), 32  }
  0x18   : > { %v224_v4 = vld [vmem:[#allocation2] sm:$0xff]  ;;  %790 = vmatpush3.bf16.msra.mxu0 %v855_v3  ;;  %v226_v14 = vld [vmem:[#allocation2 + $0x8] sm:$0xff] }
  0x19   : > { %v229_v5 = vpack.c.bf16 %v224_v4, %v224_v4  ;;  %798 = vmatpush3.bf16.msra.mxu1 %v855_v3  ;;  %803 = vmatprep.subr.bf16.mxu0 %v909_v2 }
  0x1a   : > { %811 = vmatprep.subr.bf16.mxu1 %v909_v2 }
  0x1b   : > { %792 = vmatmul.mubr.msk.bf16.vlgmr.msra.gmra.mxu0 %vm242_vm2, %v229_v5 }
  0x1c   : > { %804 = vmatpush3.bf16.msra.mxu0 %v854_v1  ;;  %807 = vmatprep.mubr.msk.bf16.mxu0 %vm910_vm1, %v909_v2 }
  0x1d   : > { %805 = vmatprep.subr.bf16.mxu0 %v909_v2 }
  0x20   : > { %806 = vmatpush3.bf16.msra.mxu0 %v855_v3 }
  0xdb   : > { %v280_v8 = vpop.f32.mrf.mxu0 }
  0xdc   : > { %v286_v9 = vadd.f32 %v280_v8, %v228_v7 }
  0xdd   : > { %v793_v10 = vpop.f32.mrf.mxu0 }
  0xde   : > { %856 = vtanh.f32 %v286_v9  ;;  %v748_v15 = vmul.f32 -1.442695, %v286_v9  ;;  %v467_v9 = vunpack.c.h.bf16 %v752_v51 }
  0xdf   : > { %v283_v11 = vpop.f32.mrf.mxu0 }
  0xe0   : > { %858 = vpow2.f32 %v748_v15 }
  0xe1   : > { %v794_v12 = vpop.f32.mrf.mxu0 }
  0xeb   : > { %v857_v13 = vpop.eup %856 }
  0xec   : > { %300 = vrot.lane.b32.xlu0 %v857_v13, %s911_s29 }
  0xed   : > { %v859_v16 = vpop.eup %858 }
  0xee   : > { %v290_v17 = vadd.f32 1.0, %v859_v16 }
  0xf0   : > { %295 = vrot.lane.b32.xlu0 %v226_v14, %s912_s30  ;;  %860 = vrcp.f32 %v290_v17 }
  0xfd   : > { %v861_v18 = vpop.eup %860 }
 0x15e   : > { %v301_v19 = vpop.permute.xlu0 %300 }
 0x15f   : > { %v303_v20 = vmul.f32 %v861_v18, %v301_v19 }
 0x161   : > { %305 = vrot.lane.b32.xlu1 %v303_v20, %s912_s30 }
 0x162   : > { %v296_v21 = vpop.permute.xlu0 %295 }
 0x163   : > { %v298_v22 = vmul.f32 %v861_v18, %v296_v21 }
 0x1d3   : > { %v306_v23 = vpop.permute.xlu1 %305 }
 0x1d4   : > { %v308_v24 = vadd.f32 %v306_v23, %v298_v22 }
 0x1d6   : > { %862 = vtanh.f32 %v308_v24 }
 0x1e3   : > { %v863_v25 = vpop.eup %862 }
 0x1e4   : > { %311 = vrot.lane.b32.xlu1 %v863_v25, %s911_s29 }
 0x256   : > { %v312_v26 = vpop.permute.xlu1 %311 }
 0x257   : > { %v314_v27 = vmul.f32 %v861_v18, %v312_v26 }
 0x259   : > { %v318_v28 = vpack.c.bf16 %v314_v27, %v314_v27 }
 0x25b   : > { %320 = vrot.lane.b32.xlu0 %v318_v28, %s912_s30 }
 0x2cd   : > { %v321_v29 = vpop.permute.xlu0 %320 }
 0x2ce   : > { %800 = vmatmul.mubr.msk.bf16.vlgmr.msra.gmra.mxu1 %vm242_vm2, %v321_v29 }
 0x2cf   : > { %812 = vmatpush3.bf16.msra.mxu1 %v854_v1  ;;  %815 = vmatprep.mubr.msk.bf16.mxu1 %vm910_vm1, %v909_v2 }
 0x2d0   : > { %813 = vmatprep.subr.bf16.mxu1 %v909_v2 }
 0x2d3   : > { %814 = vmatpush3.bf16.msra.mxu1 %v855_v3 }
 0x38e   : > { %v359_v31 = vpop.f32.mrf.mxu1 }
 0x38f   : > { %v365_v32 = vadd.f32 %v359_v31, %v317_v30 }
 0x390   : > { %v801_v33 = vpop.f32.mrf.mxu1 }
 0x391   : > { %864 = vtanh.f32 %v365_v32  ;;  %v751_v37 = vmul.f32 -1.442695, %v365_v32 }
 0x392   : > { %v362_v34 = vpop.f32.mrf.mxu1 }
 0x393   : > { %866 = vpow2.f32 %v751_v37 }
 0x394   : > { %v802_v35 = vpop.f32.mrf.mxu1 }
 0x39e   : > { %v865_v36 = vpop.eup %864 }
 0x39f   : > { %375 = vrot.lane.b32.xlu1 %v865_v36, %s911_s29 }
 0x3a0   : > { %v867_v38 = vpop.eup %866 }
 0x3a1   : > { %v369_v39 = vadd.f32 1.0, %v867_v38 }
 0x3a3   : > { %868 = vrcp.f32 %v369_v39 }
 0x3b0   : > { %v869_v40 = vpop.eup %868 }
 0x3b1   : > { %v373_v43 = vmul.f32 %v869_v40, %v308_v24 }
 0x411   : > { %v376_v41 = vpop.permute.xlu1 %375 }
 0x412   : > { %v378_v42 = vmul.f32 %v869_v40, %v376_v41 }
 0x414   : > { %380 = vrot.lane.b32.xlu0 %v378_v42, %s912_s30 }
 0x486   : > { %v381_v44 = vpop.permute.xlu0 %380 }
 0x487   : > { %v383_v45 = vadd.f32 %v381_v44, %v373_v43 }
 0x489   : > { %870 = vtanh.f32 %v383_v45 }
 0x496   : > { %v871_v46 = vpop.eup %870 }
 0x497   : > { %386 = vrot.lane.b32.xlu1 %v871_v46, %s911_s29 }
 0x509   : > { %v387_v47 = vpop.permute.xlu1 %386 }
 0x50a   : > { %v389_v48 = vmul.f32 %v869_v40, %v387_v47 }
 0x50c   : > { %v393_v49 = vpack.c.bf16 %v389_v48, %v389_v48 }
 0x50e   : > { %395 = vrot.lane.b32.xlu0 %v393_v49, %s912_s30 }
 0x580   : > { %v396_v50 = vpop.permute.xlu0 %395 }
 0x581   : > { %808 = vmatmul.mubr.msk.bf16.vlgmr.msra.gmra.mxu0 %vm242_vm2, %v396_v50 }
 0x641   : > { %v434_v53 = vpop.f32.mrf.mxu0 }
 0x642   : > { %v440_v54 = vadd.f32 %v434_v53, %v392_v52 }
 0x643   : > { %v809_v55 = vpop.f32.mrf.mxu0 }
 0x644   : > { %872 = vtanh.f32 %v440_v54  ;;  %v754_v59 = vmul.f32 -1.442695, %v440_v54 }
 0x645   : > { %v437_v56 = vpop.f32.mrf.mxu0 }
 0x646   : > { %874 = vpow2.f32 %v754_v59 }
 0x647   : > { %v810_v57 = vpop.f32.mrf.mxu0 }
 0x651   : > { %v873_v58 = vpop.eup %872 }
 0x652   : > { %450 = vrot.lane.b32.xlu1 %v873_v58, %s911_s29 }
 0x653   : > { %v875_v60 = vpop.eup %874 }
 0x654   : > { %v444_v61 = vadd.f32 1.0, %v875_v60 }
 0x656   : > { %876 = vrcp.f32 %v444_v61 }
 0x663   : > { %v877_v62 = vpop.eup %876 }
 0x664   : > { %v448_v1 = vmul.f32 %v877_v62, %v383_v45 }
 0x6c4   : > { %v451_v63 = vpop.permute.xlu1 %450 }
 0x6c5   : > { %v453_v0 = vmul.f32 %v877_v62, %v451_v63 }
 0x6c7   : > { %455 = vrot.lane.b32.xlu0 %v453_v0, %s912_s30 }
 0x739   : > { %v456_v2 = vpop.permute.xlu0 %455 }
 0x73a   : > { %v458_v3 = vadd.f32 %v456_v2, %v448_v1 }
 0x73c   : > { %878 = vtanh.f32 %v458_v3 }
 0x749   : > { %v879_v4 = vpop.eup %878 }
 0x74a   : > { %461 = vrot.lane.b32.xlu1 %v879_v4, %s911_s29 }
 0x7bc   : > { %v462_v5 = vpop.permute.xlu1 %461 }
 0x7bd   : > { %v464_v6 = vmul.f32 %v877_v62, %v462_v5 }
 0x7bf   : > { %v468_v7 = vpack.c.bf16 %v464_v6, %v464_v6 }
 0x7c1   : > { %470 = vrot.lane.b32.xlu0 %v468_v7, %s912_s30 }
 0x833   : > { %v471_v8 = vpop.permute.xlu0 %470 }
 0x834   : > { %816 = vmatmul.mubr.msk.bf16.vlgmr.msra.gmra.mxu1 %vm242_vm2, %v471_v8 }
 0x8f4   : > { %v509_v10 = vpop.f32.mrf.mxu1 }
 0x8f5   : > { %v515_v11 = vadd.f32 %v509_v10, %v467_v9 }
 0x8f6   : > { %v817_v12 = vpop.f32.mrf.mxu1 }
 0x8f7   : > { %880 = vtanh.f32 %v515_v11  ;;  %v757_v16 = vmul.f32 -1.442695, %v515_v11 }
 0x8f8   : > { %v512_v13 = vpop.f32.mrf.mxu1 }
 0x8f9   : > { %882 = vpow2.f32 %v757_v16 }
 0x8fa   : > { %v818_v14 = vpop.f32.mrf.mxu1 }
 0x904   : > { %v881_v15 = vpop.eup %880 }
 0x905   : > { %525 = vrot.lane.b32.xlu1 %v881_v15, %s911_s29 }
 0x906   : > { %v883_v17 = vpop.eup %882 }
 0x907   : > { %v519_v18 = vadd.f32 1.0, %v883_v17 }
 0x909   : > { %884 = vrcp.f32 %v519_v18 }
 0x916   : > { %v885_v19 = vpop.eup %884 }
 0x917   : > { %v523_v22 = vmul.f32 %v885_v19, %v458_v3 }
 0x977   : > { %v526_v20 = vpop.permute.xlu1 %525 }
 0x978   : > { %v528_v21 = vmul.f32 %v885_v19, %v526_v20 }
 0x97a   : > { %530 = vrot.lane.b32.xlu0 %v528_v21, %s912_s30 }
 0x9ec   : > { %v531_v23 = vpop.permute.xlu0 %530 }
 0x9ed   : > { %v533_v24 = vadd.f32 %v531_v23, %v523_v22 }
 0x9ef   : > { %886 = vtanh.f32 %v533_v24 }
 0x9fc   : > { %v887_v25 = vpop.eup %886 }
 0x9fd   : > { %536 = vrot.lane.b32.xlu1 %v887_v25, %s911_s29 }
 0xa01   : > { %546 = vrot.lane.b32.xlu1 %v533_v24, %s913_s6 }
 0xa6f   : > { %v537_v26 = vpop.permute.xlu1 %536 }
 0xa70   : > { %v539_v27 = vmul.f32 %v885_v19, %v537_v26 }
 0xa72   : > { %541 = vrot.lane.b32.xlu0 %v539_v27, %s912_s30 }
 0xa73   : > { %v547_v28 = vpop.permute.xlu1 %546 }
 0xa74   : > { %549 = vst.msk [vmem:[#allocation2 + $0x8] sm:$0xff] %vm242_vm2, %v547_v28 }
 0xae1   : > { %553 = sbr.rel (%p758_p5) target bundleno = 3375 (0xd2f), region = 48 }
 0xae4   : > { %v542_v29 = vpop.permute.xlu0 %541 }
 0xae5   : > { %544 = vst.msk [vmem:[#allocation2] sm:$0xff] %vm242_vm2, %v542_v29 }
 0xae6   : > { %v554_v30 = vld [vmem:[%s1029_s1] sm:$0xf]  ;;  %v888_v39 = vld [vmem:[%s1031_s3 + $0x18] sm:$0xff]   ;;  %v890_v40 = vld [vmem:[%s1031_s3 + $0x8] sm:$0xff]   ;;  %v915_v41 = vmov 0.0   ;;  %vm916_vm3 = vmmov 0   ;;  %v582_v48 = vpack.c.bf16 %v539_v27, %v539_v27 }
 0xae7   : > { %v555_v31 = vunpack.c.l.bf16 %v554_v30  ;;  %819 = vmatprep.subr.bf16.mxu0 %v915_v41  ;;  %827 = vmatprep.subr.bf16.mxu1 %v915_v41  ;;  %v889_v42 = vld [vmem:[%s1031_s3 + $0x10] sm:$0xff]   ;;  %v891_v44 = vld [vmem:[%s1031_s3] sm:$0xff]   ;;  %vm708_vm4 = vcmask 23552  }
 0xae8   : > { %820 = vmatpush3.bf16.msra.mxu0 %v888_v39  ;;  %828 = vmatpush3.bf16.msra.mxu1 %v890_v40  ;;  %v766_v55 = vld [vmem:[%s1032_s4] ss:$0 sm:$0xff] }
 0xae9   : > { %892 = vtanh.f32 %v555_v31  ;;  %v759_v33 = vmul.f32 -1.442695, %v555_v31  ;;  %821 = vmatprep.subr.bf16.mxu0 %v915_v41  ;;  %823 = vmatprep.mubr.msk.bf16.mxu0 %vm916_vm3, %v915_v41 }
 0xaea   : > { %829 = vmatprep.subr.bf16.mxu1 %v915_v41  ;;  %831 = vmatprep.mubr.msk.bf16.mxu1 %vm916_vm3, %v915_v41 }
 0xaeb   : > { %894 = vpow2.f32 %v759_v33 }
 0xaec   : > { %822 = vmatpush3.bf16.msra.mxu0 %v889_v42  ;;  %830 = vmatpush3.bf16.msra.mxu1 %v891_v44 }
 0xaf6   : > { %v893_v32 = vpop.eup %892 }
 0xaf7   : > { %564 = vrot.lane.b32.xlu0 %v893_v32, %s914_s9 }
 0xaf8   : > { %v895_v34 = vpop.eup %894 }
 0xaf9   : > { %v559_v35 = vadd.f32 1.0, %v895_v34 }
 0xafb   : > { %896 = vrcp.f32 %v559_v35 }
 0xb08   : > { %v897_v36 = vpop.eup %896 }
 0xb69   : > { %v565_v37 = vpop.permute.xlu0 %564 }
 0xb6a   : > { %v567_v38 = vmul.f32 %v897_v36, %v565_v37 }
 0xb6c   : > { %898 = vtanh.f32 %v567_v38 }
 0xb79   : > { %v899_v43 = vpop.eup %898 }
 0xb7a   : > { %570 = vrot.lane.b32.xlu0 %v899_v43, %s917_s16 }
 0xbec   : > { %v571_v45 = vpop.permute.xlu0 %570 }
 0xbed   : > { %v573_v46 = vmul.f32 %v897_v36, %v571_v45 }
 0xbef   : > { %v583_v47 = vpack.c.bf16 %v573_v46, %v573_v46 }
 0xbf1   : > { %585 = vrot.lane.b32.xlu1 %v583_v47, %s918_s20 }
 0xbf5   : > { %643 = vrot.lane.b32.xlu1 %v582_v48, %s918_s20 }
 0xc63   : > { %v586_v49 = vpop.permute.xlu1 %585 }
 0xc64   : > { %824 = vmatmul.mubr.msk.bf16.vlgmr.msra.gmra.mxu0 %vm242_vm2, %v586_v49 }
 0xc67   : > { %v644_v50 = vpop.permute.xlu1 %643 }
 0xc68   : > { %832 = vmatmul.mubr.msk.bf16.vlgmr.msra.gmra.mxu1 %vm242_vm2, %v644_v50 }
 0xd24   : > { %v636_v51 = vpop.f32.mrf.mxu0 }
 0xd26   : > { %v825_v52 = vpop.f32.mrf.mxu0 }
 0xd28   : > { %v639_v53 = vpop.f32.mrf.mxu0  ;;  %v694_v54 = vpop.f32.mrf.mxu1 }
 0xd29   : > { %v695_v56 = vadd.f32 %v694_v54, %v636_v51 }
 0xd2a   : > { %v826_v57 = vpop.f32.mrf.mxu0  ;;  %v833_v58 = vpop.f32.mrf.mxu1 }
 0xd2b   : > { %v707_v59 = vadd.f32 %v766_v55, %v695_v56 }
 0xd2c   : > { %v697_v60 = vpop.f32.mrf.mxu1 }
 0xd2d   : > { %709 = vst.msk [vmem:[%s1033_s5] sm:$0xff] %vm708_vm4, %v707_v59 }
 0xd2e   : > { %v834_v61 = vpop.f32.mrf.mxu1 }
 0xd2f PF: > { %s15_s18 = sadd.s32 1, %s906_s18  }
 0xd30   : > { %p12_p6 = scmp.ge.s32.totalorder %s15_s18, 4  }
 0xd32   :  { %14 = sbr.rel (!%p12_p6) target bundleno = 1 (0x1), region = 78 }

</bundles_post_ra>
